<compile_context>
chip_gen: v6e
topology: v6e:2x2x1
jax: 0.10.0
libtpu: 0.0.40
codegen_flags: <defaults>
</compile_context>

<pallas_src>
import math
import functools

import jax
import jax.numpy as jnp
from jax.experimental import pallas as pl
from jax.experimental.pallas import tpu as pltpu


def _rope_attn_kernel(sin_ref, cos_ref, x_ref,
                      wqkv_ref, bqkv_ref, wout_ref, bout_ref,
                      out_ref, *, num_heads, head_dim, block_b, seq_len,
                      mxu_dtype, exp_dtype):
    """One batch-block of RoPE multi-head self-attention.

    sin_ref   : (S, hd)   sign-folded sin table ([-sin | sin]), f32
    cos_ref   : (S, hd)   cos table ([cos | cos]), f32
    x_ref     : (Bt, S, E) input block (already at MXU dtype when bf16 path)
    wqkv_ref  : (E, 3E)   qkv weight, pre-transposed, q-cols pre-scaled
    bqkv_ref  : (1, 3E)   qkv bias (f32), q part pre-scaled
    wout_ref  : (E, E)    out-proj weight, pre-transposed
    bout_ref  : (1, E)    out-proj bias (f32)
    out_ref   : (Bt, S, E)
    """
    H, hd, Bt, S = num_heads, head_dim, block_b, seq_len
    E = H * hd
    half = hd // 2
    M = Bt * S

    # ---- Fused QKV projection: one (M, E) x (E, 3E) MXU matmul, f32 accum.
    x = x_ref[...].reshape(M, E)
    if x.dtype != mxu_dtype:
        x = x.astype(mxu_dtype)
    qkv = jnp.dot(x, wqkv_ref[...], preferred_element_type=jnp.float32)
    qkv = qkv + bqkv_ref[...]                                   # (M, 3E) f32

    # ---- Heads-batched layout (G, S, hd), G = Bt*H (bt-major, head-minor).
    # Only the layout change is per-head; all math below stays heads-batched.
    def to_heads(col_base):
        parts = [qkv[:, col_base + h * hd: col_base + (h + 1) * hd]
                 .reshape(Bt, 1, S, hd) for h in range(H)]
        return jnp.concatenate(parts, axis=1).reshape(Bt * H, S, hd)

    q = to_heads(0)
    k = to_heads(E)
    v = to_heads(2 * E)

    # ---- RoPE with sign-folded sin:
    #      rotate_half(x) * [sin|sin] == swap_halves(x) * [-sin|sin].
    sin_s = sin_ref[...][None]                                  # (1, S, hd)
    cos = cos_ref[...][None]
    if hd % 128 == 0:
        # Lane-aligned head_dim: XLU rotate (free slot alongside VPU/MXU work).
        def swap_halves(a):
            return pltpu.roll(a, shift=half, axis=2)
    else:
        # Small head_dim: single static slice-swap (no negations needed).
        def swap_halves(a):
            return jnp.concatenate([a[..., half:], a[..., :half]], axis=-1)

    q = q * cos + swap_halves(q) * sin_s        # 1/sqrt(hd) already folded in
    k = k * cos + swap_halves(k) * sin_s

    # ---- Attention, batched over G on the MXU.  Softmax normalization is
    # deferred to after the PV matmul (O(G*S*hd) instead of O(G*S*S)).
    scores = jnp.einsum('gqd,gkd->gqk',
                        q.astype(mxu_dtype), k.astype(mxu_dtype),
                        preferred_element_type=jnp.float32)     # (G, S, S)
    scores = scores - jnp.max(scores, axis=-1, keepdims=True)
    p = jnp.exp(scores.astype(exp_dtype))       # bf16 exp on v6e/v7x paths
    denom = jnp.sum(p, axis=-1, keepdims=True, dtype=jnp.float32)
    ctx = jnp.einsum('gqk,gkd->gqd',
                     p.astype(mxu_dtype), v.astype(mxu_dtype),
                     preferred_element_type=jnp.float32)        # (G, S, hd)
    ctx = ctx * pl.reciprocal(denom, approx=True)               # EUP recip

    # ---- Back to (M, E) lane layout and one fused output projection.
    ctx4 = ctx.reshape(Bt, H, S, hd)
    attn = jnp.concatenate([ctx4[:, h].reshape(M, hd) for h in range(H)],
                           axis=-1)                             # (M, E)
    out = jnp.dot(attn.astype(mxu_dtype), wout_ref[...],
                  preferred_element_type=jnp.float32)
    out = out + bout_ref[...]
    out_ref[...] = out.reshape(Bt, S, E).astype(out_ref.dtype)


def _tpu_info():
    """Return (vmem_capacity_bytes, two_tensorcores, is_v5) with safe fallbacks."""
    kind = ""
    try:
        kind = (jax.devices()[0].device_kind or "").lower()
    except Exception:
        pass
    two_tc = "v7" in kind         # v7x: 2 TensorCores/chip, 64 MiB VMEM per TC
    is_v5 = "v5" in kind          # v5e/v5p: no bf16 VPU/EUP
    try:
        vmem_cap = int(pltpu.get_tpu_info().vmem_capacity_bytes)
    except Exception:
        vmem_cap = (64 if two_tc else 128) * 1024 * 1024
    return vmem_cap, two_tc, is_v5


def _pick_block_b(B, S, E, num_heads, *, itemsize, exp_itemsize, out_itemsize,
                  act_budget, two_tensorcores, m_target=256):
    """Batch rows per grid step: largest block_b that fits the activation
    budget, targeting block_b*S >= m_target rows so the 256-wide MXUs
    (v6e/v7x) are filled by the fused projections.  Only on 2-TensorCore
    chips (v7x) do we keep >= 2 grid steps so both cores get work; on
    single-TC chips (v5e/v6e) the grid is a serial loop and splitting only
    adds per-step overhead."""
    hd = E // num_heads

    def bytes_needed(bb):
        g = bb * num_heads
        m = bb * S
        io = 2 * (itemsize + out_itemsize) * m * E      # double-buffered x / out blocks
        qkv = 4 * m * 3 * E                              # qkv (f32)
        heads = 4 * 3 * g * S * hd                       # q / k / v (f32)
        scores = 4 * g * S * S                           # scores (f32)
        probs = exp_itemsize * g * S * S                 # un-normalized probs
        ctx = 4 * g * S * hd
        proj = 2 * 4 * m * E                             # attn + out (f32)
        return io + qkv + heads + scores + probs + ctx + proj

    best = 1
    for bb in range(1, B + 1):
        if B % bb:
            continue
        if two_tensorcores and B >= 2 and B // bb < 2:
            continue
        if bytes_needed(bb) > act_budget:
            break
        best = bb
        if bb * S >= m_target:
            break
    return best


def rope_mha_forward(query, w_qkv, b_qkv, w_out, b_out, num_heads, *,
                     batch_first=False, block_b=None,
                     mxu_dtype=jnp.bfloat16):
    """query: (S, B, E) if batch_first=False else (B, S, E). Same layout out."""
    # TODO(synk): the batch_first=False transpose is a wrapper-side HBM round
    # trip; fusing it as an in-VMEM relayout inside the kernel is future work.
    x = query if batch_first else jnp.transpose(query, (1, 0, 2))   # (B, S, E)
    B, S, E = x.shape
    hd = E // num_heads
    assert hd * num_heads == E, "embed_dim must be divisible by num_heads"
    assert hd % 2 == 0, "head_dim must be even for rotate-half RoPE"
    out_dtype = x.dtype

    vmem_cap, two_tc, is_v5 = _tpu_info()
    vmem_limit = max(32 * 1024 * 1024, int(0.75 * vmem_cap))

    # Rotary tables (plain JAX glue).  sin is sign-folded so the kernel only
    # needs a half-swap: rotate_half(x)*[sin|sin] == swap_halves(x)*[-sin|sin].
    inv_freq = 1.0 / (10000.0 ** (jnp.arange(0, hd, 2, dtype=jnp.float32) / hd))
    t = jnp.arange(S, dtype=jnp.float32)
    freqs = t[:, None] * inv_freq[None, :]                      # (S, hd/2)
    sin_h, cos_h = jnp.sin(freqs), jnp.cos(freqs)
    cos_t = jnp.concatenate([cos_h, cos_h], axis=-1)            # (S, hd)
    sin_signed = jnp.concatenate([-sin_h, sin_h], axis=-1)      # (S, hd)

    # PyTorch Linear computes x @ W^T + b: pre-transpose weights.  Fold the
    # attention scale 1/sqrt(hd) into the q columns (RoPE is linear, so this
    # commutes with the rotation).  Weights at MXU dtype, biases stay f32.
    scale = 1.0 / math.sqrt(hd)
    col_scale = jnp.concatenate([jnp.full((E,), scale, dtype=jnp.float32),
                                 jnp.ones((2 * E,), dtype=jnp.float32)])
    wqkv_t = (w_qkv.astype(jnp.float32).T * col_scale[None, :]).astype(mxu_dtype)
    bqkv = (b_qkv.astype(jnp.float32) * col_scale).reshape(1, 3 * E)
    wout_t = w_out.T.astype(mxu_dtype)                          # (E, E)
    bout = b_out.astype(jnp.float32).reshape(1, E)

    # Feed x at MXU precision (halves x DMA for bf16); output stays out_dtype.
    x_in = x.astype(mxu_dtype) if x.dtype != mxu_dtype else x

    # exp in bf16 only where the EUP supports it (v6e/v7x); f32 otherwise.
    exp_dtype = (jnp.bfloat16
                 if (mxu_dtype == jnp.bfloat16 and not is_v5)
                 else jnp.float32)

    if block_b is None:
        block_b = _pick_block_b(
            B, S, E, num_heads,
            itemsize=jnp.dtype(mxu_dtype).itemsize,
            exp_itemsize=jnp.dtype(exp_dtype).itemsize,
            out_itemsize=jnp.dtype(out_dtype).itemsize,
            act_budget=int(0.6 * vmem_limit),
            two_tensorcores=two_tc)
    assert B % block_b == 0
    grid = (B // block_b,)

    kernel = functools.partial(_rope_attn_kernel,
                               num_heads=num_heads, head_dim=hd,
                               block_b=block_b, seq_len=S,
                               mxu_dtype=mxu_dtype, exp_dtype=exp_dtype)

    def run(single_buffer_weights):
        def const_spec(shape):
            n = len(shape)

            def idx(b):
                return (0,) * n

            if single_buffer_weights:
                # Grid-invariant operand: single buffer (constant index_map,
                # so double-buffering only wastes VMEM).
                return pl.BlockSpec(shape, idx, pipeline_mode=pl.Buffered(1))
            return pl.BlockSpec(shape, idx)

        grid_spec = pltpu.PrefetchScalarGridSpec(
            num_scalar_prefetch=0,
            grid=grid,
            in_specs=[
                const_spec((S, hd)),                                 # sin_signed
                const_spec((S, hd)),                                 # cos
                pl.BlockSpec((block_b, S, E), lambda b: (b, 0, 0)),  # x
                const_spec((E, 3 * E)),                              # Wqkv^T
                const_spec((1, 3 * E)),                              # bqkv
                const_spec((E, E)),                                  # Wout^T
                const_spec((1, E)),                                  # bout
            ],
            out_specs=pl.BlockSpec((block_b, S, E), lambda b: (b, 0, 0)),
        )
        return pl.pallas_call(
            kernel,
            out_shape=jax.ShapeDtypeStruct((B, S, E), out_dtype),
            grid_spec=grid_spec,
            compiler_params=pltpu.CompilerParams(
                dimension_semantics=("parallel",),
                vmem_limit_bytes=vmem_limit),
        )(sin_signed, cos_t, x_in, wqkv_t, bqkv, wout_t, bout)

    try:
        out = run(single_buffer_weights=True)
    except Exception:
        # TODO(synk): pipeline_mode=pl.Buffered(1) not supported on this jax
        # version -- fall back to default double-buffering of the weights.
        out = run(single_buffer_weights=False)

    return out if batch_first else jnp.transpose(out, (1, 0, 2))


def _reference_forward(query, w_qkv, b_qkv, w_out, b_out, num_heads,
                       *, batch_first=False):
    """Pure-JAX f32 reference mirroring the PyTorch forward."""
    x = query if batch_first else jnp.transpose(query, (1, 0, 2))
    B, S, E = x.shape
    hd = E // num_heads

    qkv = x @ w_qkv.T + b_qkv                                   # (B, S, 3E)
    qkv = qkv.reshape(B, S, 3, num_heads, hd).transpose(2, 0, 3, 1, 4)
    q, k, v = qkv[0], qkv[1], qkv[2]                            # (B, H, S, hd)

    inv_freq = 1.0 / (10000.0 ** (jnp.arange(0, hd, 2, dtype=jnp.float32) / hd))
    t = jnp.arange(S, dtype=jnp.float32)
    freqs = t[:, None] * inv_freq[None, :]
    sin = jnp.concatenate([jnp.sin(freqs), jnp.sin(freqs)], axis=-1)
    cos = jnp.concatenate([jnp.cos(freqs), jnp.cos(freqs)], axis=-1)

    def rot_half(a):
        a1, a2 = jnp.split(a, 2, axis=-1)
        return jnp.concatenate([-a2, a1], axis=-1)

    q = q * cos + rot_half(q) * sin
    k = k * cos + rot_half(k) * sin
    scores = jnp.einsum("bhqd,bhkd->bhqk", q, k) / math.sqrt(hd)
    probs = jax.nn.softmax(scores, axis=-1)
    out = jnp.einsum("bhqk,bhkd->bhqd", probs, v)
    out = out.transpose(0, 2, 1, 3).reshape(B, S, E)
    out = out @ w_out.T + b_out
    return out if batch_first else jnp.transpose(out, (1, 0, 2))


if __name__ == "__main__":
    # Small shapes consistent with the module: seq=8, batch=2, embed=32, heads=4.
    S, B, E, H = 8, 2, 32, 4

    key = jax.random.PRNGKey(0)
    k1, k2, k3, k4, k5 = jax.random.split(key, 5)

    bound = 1.0 / math.sqrt(E)
    w_qkv = jax.random.uniform(k1, (3 * E, E), jnp.float32, -bound, bound)
    b_qkv = jax.random.uniform(k2, (3 * E,), jnp.float32, -bound, bound)
    w_out = jax.random.uniform(k3, (E, E), jnp.float32, -bound, bound)
    b_out = jax.random.uniform(k4, (E,), jnp.float32, -bound, bound)

    # Input in PyTorch default layout (batch_first=False): (S, B, E).
    query = jax.random.normal(k5, (S, B, E), jnp.float32)

    ref = _reference_forward(query, w_qkv, b_qkv, w_out, b_out, H,
                             batch_first=False)

    # Full-f32 MXU path: tight check (slack only for the approx EUP reciprocal
    # used in the softmax normalization).
    out_f32 = jax.block_until_ready(
        rope_mha_forward(query, w_qkv, b_qkv, w_out, b_out, H,
                         batch_first=False, mxu_dtype=jnp.float32))
    assert out_f32.shape == (S, B, E)
    assert jnp.allclose(out_f32, ref, atol=5e-3, rtol=5e-3), \
        "f32 kernel mismatch vs reference"

    # Default bf16-fed MXU path (what v6e/v7x want): looser tolerance
    # (bf16 input/weights/exp).
    out_bf16 = jax.block_until_ready(
        rope_mha_forward(query, w_qkv, b_qkv, w_out, b_out, H,
                         batch_first=False, mxu_dtype=jnp.bfloat16))
    assert out_bf16.shape == (S, B, E)
    assert jnp.allclose(out_bf16, ref, atol=7.5e-2, rtol=7.5e-2), \
        "bf16 kernel mismatch vs reference"

    print("KERNEL_OK")
</pallas_src>

<mosaic_0001>
module attributes {stable_mosaic.version = 11 : i64} {
  func.func @_rope_attn_kernel(%arg0: i32, %arg1: memref<8x8xf32, #tpu.memory_space<vmem>>, %arg2: memref<8x8xf32, #tpu.memory_space<vmem>>, %arg3: memref<2x8x32xf32, #tpu.memory_space<vmem>>, %arg4: memref<32x96xf32, #tpu.memory_space<vmem>>, %arg5: memref<1x96xf32, #tpu.memory_space<vmem>>, %arg6: memref<32x32xf32, #tpu.memory_space<vmem>>, %arg7: memref<1x32xf32, #tpu.memory_space<vmem>>, %arg8: memref<2x8x32xf32, #tpu.memory_space<vmem>>) attributes {dimension_semantics = [#tpu.dimension_semantics<parallel>], iteration_bounds = array<i64: 1>, scalar_prefetch = 0 : i64, scratch_operands = 0 : i64, tpu.core_type = #tpu.core_type<tc>, window_params = [{pipeline_mode = #tpu.pipeline_mode<synchronous>, transform_indices = @transform_0, window_bounds = array<i64: 8, 8>}, {pipeline_mode = #tpu.pipeline_mode<synchronous>, transform_indices = @transform_1, window_bounds = array<i64: 8, 8>}, {transform_indices = @transform_2, window_bounds = array<i64: 2, 8, 32>}, {pipeline_mode = #tpu.pipeline_mode<synchronous>, transform_indices = @transform_3, window_bounds = array<i64: 32, 96>}, {pipeline_mode = #tpu.pipeline_mode<synchronous>, transform_indices = @transform_4, window_bounds = array<i64: 1, 96>}, {pipeline_mode = #tpu.pipeline_mode<synchronous>, transform_indices = @transform_5, window_bounds = array<i64: 32, 32>}, {pipeline_mode = #tpu.pipeline_mode<synchronous>, transform_indices = @transform_6, window_bounds = array<i64: 1, 32>}, {transform_indices = @transform_7, window_bounds = array<i64: 2, 8, 32>}]} {
    %c0 = arith.constant 0 : index
    %c0_0 = arith.constant 0 : index
    %c0_1 = arith.constant 0 : index
    %0 = vector.load %arg3[%c0, %c0_0, %c0_1] : memref<2x8x32xf32, #tpu.memory_space<vmem>>, vector<2x8x32xf32>
    %1 = vector.shape_cast %0 : vector<2x8x32xf32> to vector<16x32xf32>
    %c0_2 = arith.constant 0 : index
    %c0_3 = arith.constant 0 : index
    %2 = vector.load %arg4[%c0_2, %c0_3] : memref<32x96xf32, #tpu.memory_space<vmem>>, vector<32x96xf32>
    %cst = arith.constant dense<0.000000e+00> : vector<16x96xf32>
    %3 = tpu.matmul %1, %2, %cst {dimension_numbers = #tpu.dot_dimension_numbers<[1], [0], [0], [1], [0, 0, 1, 1], [], []>} : vector<16x32xf32>, vector<32x96xf32>, vector<16x96xf32> -> vector<16x96xf32>
    %c0_4 = arith.constant 0 : index
    %c0_5 = arith.constant 0 : index
    %4 = vector.load %arg5[%c0_4, %c0_5] : memref<1x96xf32, #tpu.memory_space<vmem>>, vector<1x96xf32>
    %5 = vector.broadcast %4 : vector<1x96xf32> to vector<16x96xf32>
    %6 = arith.addf %3, %5 : vector<16x96xf32>
    %7 = vector.extract_strided_slice %6 {offsets = [0, 0], sizes = [16, 8], strides = [1, 1]} : vector<16x96xf32> to vector<16x8xf32>
    %8 = vector.shape_cast %7 : vector<16x8xf32> to vector<2x1x8x8xf32>
    %9 = vector.extract_strided_slice %6 {offsets = [0, 8], sizes = [16, 8], strides = [1, 1]} : vector<16x96xf32> to vector<16x8xf32>
    %10 = vector.shape_cast %9 : vector<16x8xf32> to vector<2x1x8x8xf32>
    %11 = vector.extract_strided_slice %6 {offsets = [0, 16], sizes = [16, 8], strides = [1, 1]} : vector<16x96xf32> to vector<16x8xf32>
    %12 = vector.shape_cast %11 : vector<16x8xf32> to vector<2x1x8x8xf32>
    %13 = vector.extract_strided_slice %6 {offsets = [0, 24], sizes = [16, 8], strides = [1, 1]} : vector<16x96xf32> to vector<16x8xf32>
    %14 = vector.shape_cast %13 : vector<16x8xf32> to vector<2x1x8x8xf32>
    %15 = tpu.concatenate %8, %10, %12, %14 in 1 : vector<2x1x8x8xf32>, vector<2x1x8x8xf32>, vector<2x1x8x8xf32>, vector<2x1x8x8xf32> -> vector<2x4x8x8xf32>
    %16 = vector.shape_cast %15 : vector<2x4x8x8xf32> to vector<8x8x8xf32>
    %17 = vector.extract_strided_slice %6 {offsets = [0, 32], sizes = [16, 8], strides = [1, 1]} : vector<16x96xf32> to vector<16x8xf32>
    %18 = vector.shape_cast %17 : vector<16x8xf32> to vector<2x1x8x8xf32>
    %19 = vector.extract_strided_slice %6 {offsets = [0, 40], sizes = [16, 8], strides = [1, 1]} : vector<16x96xf32> to vector<16x8xf32>
    %20 = vector.shape_cast %19 : vector<16x8xf32> to vector<2x1x8x8xf32>
    %21 = vector.extract_strided_slice %6 {offsets = [0, 48], sizes = [16, 8], strides = [1, 1]} : vector<16x96xf32> to vector<16x8xf32>
    %22 = vector.shape_cast %21 : vector<16x8xf32> to vector<2x1x8x8xf32>
    %23 = vector.extract_strided_slice %6 {offsets = [0, 56], sizes = [16, 8], strides = [1, 1]} : vector<16x96xf32> to vector<16x8xf32>
    %24 = vector.shape_cast %23 : vector<16x8xf32> to vector<2x1x8x8xf32>
    %25 = tpu.concatenate %18, %20, %22, %24 in 1 : vector<2x1x8x8xf32>, vector<2x1x8x8xf32>, vector<2x1x8x8xf32>, vector<2x1x8x8xf32> -> vector<2x4x8x8xf32>
    %26 = vector.shape_cast %25 : vector<2x4x8x8xf32> to vector<8x8x8xf32>
    %27 = vector.extract_strided_slice %6 {offsets = [0, 64], sizes = [16, 8], strides = [1, 1]} : vector<16x96xf32> to vector<16x8xf32>
    %28 = vector.shape_cast %27 : vector<16x8xf32> to vector<2x1x8x8xf32>
    %29 = vector.extract_strided_slice %6 {offsets = [0, 72], sizes = [16, 8], strides = [1, 1]} : vector<16x96xf32> to vector<16x8xf32>
    %30 = vector.shape_cast %29 : vector<16x8xf32> to vector<2x1x8x8xf32>
    %31 = vector.extract_strided_slice %6 {offsets = [0, 80], sizes = [16, 8], strides = [1, 1]} : vector<16x96xf32> to vector<16x8xf32>
    %32 = vector.shape_cast %31 : vector<16x8xf32> to vector<2x1x8x8xf32>
    %33 = vector.extract_strided_slice %6 {offsets = [0, 88], sizes = [16, 8], strides = [1, 1]} : vector<16x96xf32> to vector<16x8xf32>
    %34 = vector.shape_cast %33 : vector<16x8xf32> to vector<2x1x8x8xf32>
    %35 = tpu.concatenate %28, %30, %32, %34 in 1 : vector<2x1x8x8xf32>, vector<2x1x8x8xf32>, vector<2x1x8x8xf32>, vector<2x1x8x8xf32> -> vector<2x4x8x8xf32>
    %36 = vector.shape_cast %35 : vector<2x4x8x8xf32> to vector<8x8x8xf32>
    %c0_6 = arith.constant 0 : index
    %c0_7 = arith.constant 0 : index
    %37 = vector.load %arg1[%c0_6, %c0_7] : memref<8x8xf32, #tpu.memory_space<vmem>>, vector<8x8xf32>
    %38 = vector.shape_cast %37 : vector<8x8xf32> to vector<1x8x8xf32>
    %c0_8 = arith.constant 0 : index
    %c0_9 = arith.constant 0 : index
    %39 = vector.load %arg2[%c0_8, %c0_9] : memref<8x8xf32, #tpu.memory_space<vmem>>, vector<8x8xf32>
    %40 = vector.shape_cast %39 : vector<8x8xf32> to vector<1x8x8xf32>
    %41 = vector.broadcast %40 : vector<1x8x8xf32> to vector<8x8x8xf32>
    %42 = arith.mulf %16, %41 : vector<8x8x8xf32>
    %43 = vector.extract_strided_slice %16 {offsets = [0, 0, 4], sizes = [8, 8, 4], strides = [1, 1, 1]} : vector<8x8x8xf32> to vector<8x8x4xf32>
    %44 = vector.extract_strided_slice %16 {offsets = [0, 0, 0], sizes = [8, 8, 4], strides = [1, 1, 1]} : vector<8x8x8xf32> to vector<8x8x4xf32>
    %45 = tpu.concatenate %43, %44 in 2 : vector<8x8x4xf32>, vector<8x8x4xf32> -> vector<8x8x8xf32>
    %46 = vector.broadcast %38 : vector<1x8x8xf32> to vector<8x8x8xf32>
    %47 = arith.mulf %45, %46 : vector<8x8x8xf32>
    %48 = arith.addf %42, %47 : vector<8x8x8xf32>
    %49 = vector.broadcast %40 : vector<1x8x8xf32> to vector<8x8x8xf32>
    %50 = arith.mulf %26, %49 : vector<8x8x8xf32>
    %51 = vector.extract_strided_slice %26 {offsets = [0, 0, 4], sizes = [8, 8, 4], strides = [1, 1, 1]} : vector<8x8x8xf32> to vector<8x8x4xf32>
    %52 = vector.extract_strided_slice %26 {offsets = [0, 0, 0], sizes = [8, 8, 4], strides = [1, 1, 1]} : vector<8x8x8xf32> to vector<8x8x4xf32>
    %53 = tpu.concatenate %51, %52 in 2 : vector<8x8x4xf32>, vector<8x8x4xf32> -> vector<8x8x8xf32>
    %54 = vector.broadcast %38 : vector<1x8x8xf32> to vector<8x8x8xf32>
    %55 = arith.mulf %53, %54 : vector<8x8x8xf32>
    %56 = arith.addf %50, %55 : vector<8x8x8xf32>
    "tpu.trace_start"() <{level = 10 : i32, message = "gqd,gkd->gqk"}> : () -> ()
    %cst_10 = arith.constant dense<0.000000e+00> : vector<8x8x8xf32>
    %57 = tpu.matmul %48, %56, %cst_10 {dimension_numbers = #tpu.dot_dimension_numbers<[2], [2], [1], [1], [0, 0, 0, 1, 1, 1], [0], [0]>} : vector<8x8x8xf32>, vector<8x8x8xf32>, vector<8x8x8xf32> -> vector<8x8x8xf32>
    "tpu.trace_stop"() : () -> ()
    %cst_11 = arith.constant dense<0xFF800000> : vector<8x8xf32>
    %58 = vector.multi_reduction <maximumf>, %57, %cst_11 [2] : vector<8x8x8xf32> to vector<8x8xf32>
    %59 = vector.shape_cast %58 : vector<8x8xf32> to vector<8x8x1xf32>
    %60 = vector.broadcast %59 : vector<8x8x1xf32> to vector<8x8x8xf32>
    %61 = arith.subf %57, %60 : vector<8x8x8xf32>
    %62 = math.exp %61 : vector<8x8x8xf32>
    %cst_12 = arith.constant dense<0.000000e+00> : vector<8x8xf32>
    %63 = vector.multi_reduction <add>, %62, %cst_12 [2] : vector<8x8x8xf32> to vector<8x8xf32>
    %64 = vector.shape_cast %63 : vector<8x8xf32> to vector<8x8x1xf32>
    "tpu.trace_start"() <{level = 10 : i32, message = "gqk,gkd->gqd"}> : () -> ()
    %cst_13 = arith.constant dense<0.000000e+00> : vector<8x8x8xf32>
    %65 = tpu.matmul %62, %36, %cst_13 {dimension_numbers = #tpu.dot_dimension_numbers<[2], [1], [1], [2], [0, 0, 0, 1, 1, 2], [0], [0]>} : vector<8x8x8xf32>, vector<8x8x8xf32>, vector<8x8x8xf32> -> vector<8x8x8xf32>
    "tpu.trace_stop"() : () -> ()
    %66 = tpu.reciprocal %64 {approx = true} : vector<8x8x1xf32> -> vector<8x8x1xf32>
    %67 = vector.broadcast %66 : vector<8x8x1xf32> to vector<8x8x8xf32>
    %68 = arith.mulf %65, %67 : vector<8x8x8xf32>
    %69 = vector.shape_cast %68 : vector<8x8x8xf32> to vector<2x4x8x8xf32>
    %70 = vector.extract_strided_slice %69 {offsets = [0, 0, 0, 0], sizes = [2, 1, 8, 8], strides = [1, 1, 1, 1]} : vector<2x4x8x8xf32> to vector<2x1x8x8xf32>
    %71 = vector.shape_cast %70 : vector<2x1x8x8xf32> to vector<2x8x8xf32>
    %72 = vector.shape_cast %71 : vector<2x8x8xf32> to vector<16x8xf32>
    %73 = vector.extract_strided_slice %69 {offsets = [0, 1, 0, 0], sizes = [2, 1, 8, 8], strides = [1, 1, 1, 1]} : vector<2x4x8x8xf32> to vector<2x1x8x8xf32>
    %74 = vector.shape_cast %73 : vector<2x1x8x8xf32> to vector<2x8x8xf32>
    %75 = vector.shape_cast %74 : vector<2x8x8xf32> to vector<16x8xf32>
    %76 = vector.extract_strided_slice %69 {offsets = [0, 2, 0, 0], sizes = [2, 1, 8, 8], strides = [1, 1, 1, 1]} : vector<2x4x8x8xf32> to vector<2x1x8x8xf32>
    %77 = vector.shape_cast %76 : vector<2x1x8x8xf32> to vector<2x8x8xf32>
    %78 = vector.shape_cast %77 : vector<2x8x8xf32> to vector<16x8xf32>
    %79 = vector.extract_strided_slice %69 {offsets = [0, 3, 0, 0], sizes = [2, 1, 8, 8], strides = [1, 1, 1, 1]} : vector<2x4x8x8xf32> to vector<2x1x8x8xf32>
    %80 = vector.shape_cast %79 : vector<2x1x8x8xf32> to vector<2x8x8xf32>
    %81 = vector.shape_cast %80 : vector<2x8x8xf32> to vector<16x8xf32>
    %82 = tpu.concatenate %72, %75, %78, %81 in 1 : vector<16x8xf32>, vector<16x8xf32>, vector<16x8xf32>, vector<16x8xf32> -> vector<16x32xf32>
    %c0_14 = arith.constant 0 : index
    %c0_15 = arith.constant 0 : index
    %83 = vector.load %arg6[%c0_14, %c0_15] : memref<32x32xf32, #tpu.memory_space<vmem>>, vector<32x32xf32>
    %cst_16 = arith.constant dense<0.000000e+00> : vector<16x32xf32>
    %84 = tpu.matmul %82, %83, %cst_16 {dimension_numbers = #tpu.dot_dimension_numbers<[1], [0], [0], [1], [0, 0, 1, 1], [], []>} : vector<16x32xf32>, vector<32x32xf32>, vector<16x32xf32> -> vector<16x32xf32>
    %c0_17 = arith.constant 0 : index
    %c0_18 = arith.constant 0 : index
    %85 = vector.load %arg7[%c0_17, %c0_18] : memref<1x32xf32, #tpu.memory_space<vmem>>, vector<1x32xf32>
    %86 = vector.broadcast %85 : vector<1x32xf32> to vector<16x32xf32>
    %87 = arith.addf %84, %86 : vector<16x32xf32>
    %88 = vector.shape_cast %87 : vector<16x32xf32> to vector<2x8x32xf32>
    %c0_19 = arith.constant 0 : index
    %c0_20 = arith.constant 0 : index
    %c0_21 = arith.constant 0 : index
    %89 = vector.load %arg8[%c0_19, %c0_20, %c0_21] : memref<2x8x32xf32, #tpu.memory_space<vmem>>, vector<2x8x32xf32>
    tpu.vector_store %arg8[%c0_19, %c0_20, %c0_21], %88 {strides = array<i32>} : memref<2x8x32xf32, #tpu.memory_space<vmem>>, vector<2x8x32xf32>,
    return
  }
  func.func @transform_0(%arg0: i32) -> (i32, i32) {
    %c0_i32 = arith.constant 0 : i32
    %c0_i32_0 = arith.constant 0 : i32
    %c0_i32_1 = arith.constant 0 : i32
    return %c0_i32, %c0_i32_0 : i32, i32
  }
  func.func @transform_1(%arg0: i32) -> (i32, i32) {
    %c0_i32 = arith.constant 0 : i32
    %c0_i32_0 = arith.constant 0 : i32
    %c0_i32_1 = arith.constant 0 : i32
    return %c0_i32, %c0_i32_0 : i32, i32
  }
  func.func @transform_2(%arg0: i32) -> (i32, i32, i32) {
    %c0_i32 = arith.constant 0 : i32
    %c0_i32_0 = arith.constant 0 : i32
    %c0_i32_1 = arith.constant 0 : i32
    return %arg0, %c0_i32, %c0_i32_0 : i32, i32, i32
  }
  func.func @transform_3(%arg0: i32) -> (i32, i32) {
    %c0_i32 = arith.constant 0 : i32
    %c0_i32_0 = arith.constant 0 : i32
    %c0_i32_1 = arith.constant 0 : i32
    return %c0_i32, %c0_i32_0 : i32, i32
  }
  func.func @transform_4(%arg0: i32) -> (i32, i32) {
    %c0_i32 = arith.constant 0 : i32
    %c0_i32_0 = arith.constant 0 : i32
    %c0_i32_1 = arith.constant 0 : i32
    return %c0_i32, %c0_i32_0 : i32, i32
  }
  func.func @transform_5(%arg0: i32) -> (i32, i32) {
    %c0_i32 = arith.constant 0 : i32
    %c0_i32_0 = arith.constant 0 : i32
    %c0_i32_1 = arith.constant 0 : i32
    return %c0_i32, %c0_i32_0 : i32, i32
  }
  func.func @transform_6(%arg0: i32) -> (i32, i32) {
    %c0_i32 = arith.constant 0 : i32
    %c0_i32_0 = arith.constant 0 : i32
    %c0_i32_1 = arith.constant 0 : i32
    return %c0_i32, %c0_i32_0 : i32, i32
  }
  func.func @transform_7(%arg0: i32) -> (i32, i32, i32) {
    %c0_i32 = arith.constant 0 : i32
    %c0_i32_0 = arith.constant 0 : i32
    %c0_i32_1 = arith.constant 0 : i32
    return %arg0, %c0_i32, %c0_i32_0 : i32, i32, i32
  }
}

module attributes {stable_mosaic.version = 11 : i64} {
  func.func @_rope_attn_kernel(%arg0: i32, %arg1: memref<8x8xf32, #tpu.memory_space<vmem>>, %arg2: memref<8x8xf32, #tpu.memory_space<vmem>>, %arg3: memref<2x8x32xf32, #tpu.memory_space<vmem>>, %arg4: memref<32x96xf32, #tpu.memory_space<vmem>>, %arg5: memref<1x96xf32, #tpu.memory_space<vmem>>, %arg6: memref<32x32xf32, #tpu.memory_space<vmem>>, %arg7: memref<1x32xf32, #tpu.memory_space<vmem>>, %arg8: memref<2x8x32xf32, #tpu.memory_space<vmem>>) attributes {dimension_semantics = [#tpu.dimension_semantics<parallel>], iteration_bounds = array<i64: 1>, scalar_prefetch = 0 : i64, scratch_operands = 0 : i64, tpu.core_type = #tpu.core_type<tc>, window_params = [{pipeline_mode = #tpu.pipeline_mode<synchronous>, transform_indices = @transform_0, window_bounds = array<i64: 8, 8>}, {pipeline_mode = #tpu.pipeline_mode<synchronous>, transform_indices = @transform_1, window_bounds = array<i64: 8, 8>}, {transform_indices = @transform_2, window_bounds = array<i64: 2, 8, 32>}, {pipeline_mode = #tpu.pipeline_mode<synchronous>, transform_indices = @transform_3, window_bounds = array<i64: 32, 96>}, {pipeline_mode = #tpu.pipeline_mode<synchronous>, transform_indices = @transform_4, window_bounds = array<i64: 1, 96>}, {pipeline_mode = #tpu.pipeline_mode<synchronous>, transform_indices = @transform_5, window_bounds = array<i64: 32, 32>}, {pipeline_mode = #tpu.pipeline_mode<synchronous>, transform_indices = @transform_6, window_bounds = array<i64: 1, 32>}, {transform_indices = @transform_7, window_bounds = array<i64: 2, 8, 32>}]} {
    %c0 = arith.constant 0 : index
    %c0_0 = arith.constant 0 : index
    %c0_1 = arith.constant 0 : index
    %0 = vector.load %arg3[%c0, %c0_0, %c0_1] : memref<2x8x32xf32, #tpu.memory_space<vmem>>, vector<2x8x32xf32>
    %1 = vector.shape_cast %0 : vector<2x8x32xf32> to vector<16x32xf32>
    %c0_2 = arith.constant 0 : index
    %c0_3 = arith.constant 0 : index
    %2 = vector.load %arg4[%c0_2, %c0_3] : memref<32x96xf32, #tpu.memory_space<vmem>>, vector<32x96xf32>
    %cst = arith.constant dense<0.000000e+00> : vector<16x96xf32>
    %3 = tpu.matmul %1, %2, %cst {dimension_numbers = #tpu.dot_dimension_numbers<[1], [0], [0], [1], [0, 0, 1, 1], [], []>} : vector<16x32xf32>, vector<32x96xf32>, vector<16x96xf32> -> vector<16x96xf32>
    %c0_4 = arith.constant 0 : index
    %c0_5 = arith.constant 0 : index
    %4 = vector.load %arg5[%c0_4, %c0_5] : memref<1x96xf32, #tpu.memory_space<vmem>>, vector<1x96xf32>
    %5 = vector.broadcast %4 : vector<1x96xf32> to vector<16x96xf32>
    %6 = arith.addf %3, %5 : vector<16x96xf32>
    %7 = vector.extract_strided_slice %6 {offsets = [0, 0], sizes = [16, 8], strides = [1, 1]} : vector<16x96xf32> to vector<16x8xf32>
    %8 = vector.shape_cast %7 : vector<16x8xf32> to vector<2x1x8x8xf32>
    %9 = vector.extract_strided_slice %6 {offsets = [0, 8], sizes = [16, 8], strides = [1, 1]} : vector<16x96xf32> to vector<16x8xf32>
    %10 = vector.shape_cast %9 : vector<16x8xf32> to vector<2x1x8x8xf32>
    %11 = vector.extract_strided_slice %6 {offsets = [0, 16], sizes = [16, 8], strides = [1, 1]} : vector<16x96xf32> to vector<16x8xf32>
    %12 = vector.shape_cast %11 : vector<16x8xf32> to vector<2x1x8x8xf32>
    %13 = vector.extract_strided_slice %6 {offsets = [0, 24], sizes = [16, 8], strides = [1, 1]} : vector<16x96xf32> to vector<16x8xf32>
    %14 = vector.shape_cast %13 : vector<16x8xf32> to vector<2x1x8x8xf32>
    %15 = tpu.concatenate %8, %10, %12, %14 in 1 : vector<2x1x8x8xf32>, vector<2x1x8x8xf32>, vector<2x1x8x8xf32>, vector<2x1x8x8xf32> -> vector<2x4x8x8xf32>
    %16 = vector.shape_cast %15 : vector<2x4x8x8xf32> to vector<8x8x8xf32>
    %17 = vector.extract_strided_slice %6 {offsets = [0, 32], sizes = [16, 8], strides = [1, 1]} : vector<16x96xf32> to vector<16x8xf32>
    %18 = vector.shape_cast %17 : vector<16x8xf32> to vector<2x1x8x8xf32>
    %19 = vector.extract_strided_slice %6 {offsets = [0, 40], sizes = [16, 8], strides = [1, 1]} : vector<16x96xf32> to vector<16x8xf32>
    %20 = vector.shape_cast %19 : vector<16x8xf32> to vector<2x1x8x8xf32>
    %21 = vector.extract_strided_slice %6 {offsets = [0, 48], sizes = [16, 8], strides = [1, 1]} : vector<16x96xf32> to vector<16x8xf32>
    %22 = vector.shape_cast %21 : vector<16x8xf32> to vector<2x1x8x8xf32>
    %23 = vector.extract_strided_slice %6 {offsets = [0, 56], sizes = [16, 8], strides = [1, 1]} : vector<16x96xf32> to vector<16x8xf32>
    %24 = vector.shape_cast %23 : vector<16x8xf32> to vector<2x1x8x8xf32>
    %25 = tpu.concatenate %18, %20, %22, %24 in 1 : vector<2x1x8x8xf32>, vector<2x1x8x8xf32>, vector<2x1x8x8xf32>, vector<2x1x8x8xf32> -> vector<2x4x8x8xf32>
    %26 = vector.shape_cast %25 : vector<2x4x8x8xf32> to vector<8x8x8xf32>
    %27 = vector.extract_strided_slice %6 {offsets = [0, 64], sizes = [16, 8], strides = [1, 1]} : vector<16x96xf32> to vector<16x8xf32>
    %28 = vector.shape_cast %27 : vector<16x8xf32> to vector<2x1x8x8xf32>
    %29 = vector.extract_strided_slice %6 {offsets = [0, 72], sizes = [16, 8], strides = [1, 1]} : vector<16x96xf32> to vector<16x8xf32>
    %30 = vector.shape_cast %29 : vector<16x8xf32> to vector<2x1x8x8xf32>
    %31 = vector.extract_strided_slice %6 {offsets = [0, 80], sizes = [16, 8], strides = [1, 1]} : vector<16x96xf32> to vector<16x8xf32>
    %32 = vector.shape_cast %31 : vector<16x8xf32> to vector<2x1x8x8xf32>
    %33 = vector.extract_strided_slice %6 {offsets = [0, 88], sizes = [16, 8], strides = [1, 1]} : vector<16x96xf32> to vector<16x8xf32>
    %34 = vector.shape_cast %33 : vector<16x8xf32> to vector<2x1x8x8xf32>
    %35 = tpu.concatenate %28, %30, %32, %34 in 1 : vector<2x1x8x8xf32>, vector<2x1x8x8xf32>, vector<2x1x8x8xf32>, vector<2x1x8x8xf32> -> vector<2x4x8x8xf32>
    %36 = vector.shape_cast %35 : vector<2x4x8x8xf32> to vector<8x8x8xf32>
    %c0_6 = arith.constant 0 : index
    %c0_7 = arith.constant 0 : index
    %37 = vector.load %arg1[%c0_6, %c0_7] : memref<8x8xf32, #tpu.memory_space<vmem>>, vector<8x8xf32>
    %38 = vector.shape_cast %37 : vector<8x8xf32> to vector<1x8x8xf32>
    %c0_8 = arith.constant 0 : index
    %c0_9 = arith.constant 0 : index
    %39 = vector.load %arg2[%c0_8, %c0_9] : memref<8x8xf32, #tpu.memory_space<vmem>>, vector<8x8xf32>
    %40 = vector.shape_cast %39 : vector<8x8xf32> to vector<1x8x8xf32>
    %41 = vector.broadcast %40 : vector<1x8x8xf32> to vector<8x8x8xf32>
    %42 = arith.mulf %16, %41 : vector<8x8x8xf32>
    %43 = vector.extract_strided_slice %16 {offsets = [0, 0, 4], sizes = [8, 8, 4], strides = [1, 1, 1]} : vector<8x8x8xf32> to vector<8x8x4xf32>
    %44 = vector.extract_strided_slice %16 {offsets = [0, 0, 0], sizes = [8, 8, 4], strides = [1, 1, 1]} : vector<8x8x8xf32> to vector<8x8x4xf32>
    %45 = tpu.concatenate %43, %44 in 2 : vector<8x8x4xf32>, vector<8x8x4xf32> -> vector<8x8x8xf32>
    %46 = vector.broadcast %38 : vector<1x8x8xf32> to vector<8x8x8xf32>
    %47 = arith.mulf %45, %46 : vector<8x8x8xf32>
    %48 = arith.addf %42, %47 : vector<8x8x8xf32>
    %49 = vector.broadcast %40 : vector<1x8x8xf32> to vector<8x8x8xf32>
    %50 = arith.mulf %26, %49 : vector<8x8x8xf32>
    %51 = vector.extract_strided_slice %26 {offsets = [0, 0, 4], sizes = [8, 8, 4], strides = [1, 1, 1]} : vector<8x8x8xf32> to vector<8x8x4xf32>
    %52 = vector.extract_strided_slice %26 {offsets = [0, 0, 0], sizes = [8, 8, 4], strides = [1, 1, 1]} : vector<8x8x8xf32> to vector<8x8x4xf32>
    %53 = tpu.concatenate %51, %52 in 2 : vector<8x8x4xf32>, vector<8x8x4xf32> -> vector<8x8x8xf32>
    %54 = vector.broadcast %38 : vector<1x8x8xf32> to vector<8x8x8xf32>
    %55 = arith.mulf %53, %54 : vector<8x8x8xf32>
    %56 = arith.addf %50, %55 : vector<8x8x8xf32>
    "tpu.trace_start"() <{level = 10 : i32, message = "gqd,gkd->gqk"}> : () -> ()
    %cst_10 = arith.constant dense<0.000000e+00> : vector<8x8x8xf32>
    %57 = tpu.matmul %48, %56, %cst_10 {dimension_numbers = #tpu.dot_dimension_numbers<[2], [2], [1], [1], [0, 0, 0, 1, 1, 1], [0], [0]>} : vector<8x8x8xf32>, vector<8x8x8xf32>, vector<8x8x8xf32> -> vector<8x8x8xf32>
    "tpu.trace_stop"() : () -> ()
    %cst_11 = arith.constant dense<0xFF800000> : vector<8x8xf32>
    %58 = vector.multi_reduction <maximumf>, %57, %cst_11 [2] : vector<8x8x8xf32> to vector<8x8xf32>
    %59 = vector.shape_cast %58 : vector<8x8xf32> to vector<8x8x1xf32>
    %60 = vector.broadcast %59 : vector<8x8x1xf32> to vector<8x8x8xf32>
    %61 = arith.subf %57, %60 : vector<8x8x8xf32>
    %62 = math.exp %61 : vector<8x8x8xf32>
    %cst_12 = arith.constant dense<0.000000e+00> : vector<8x8xf32>
    %63 = vector.multi_reduction <add>, %62, %cst_12 [2] : vector<8x8x8xf32> to vector<8x8xf32>
    %64 = vector.shape_cast %63 : vector<8x8xf32> to vector<8x8x1xf32>
    "tpu.trace_start"() <{level = 10 : i32, message = "gqk,gkd->gqd"}> : () -> ()
    %cst_13 = arith.constant dense<0.000000e+00> : vector<8x8x8xf32>
    %65 = tpu.matmul %62, %36, %cst_13 {dimension_numbers = #tpu.dot_dimension_numbers<[2], [1], [1], [2], [0, 0, 0, 1, 1, 2], [0], [0]>} : vector<8x8x8xf32>, vector<8x8x8xf32>, vector<8x8x8xf32> -> vector<8x8x8xf32>
    "tpu.trace_stop"() : () -> ()
    %66 = tpu.reciprocal %64 {approx = true} : vector<8x8x1xf32> -> vector<8x8x1xf32>
    %67 = vector.broadcast %66 : vector<8x8x1xf32> to vector<8x8x8xf32>
    %68 = arith.mulf %65, %67 : vector<8x8x8xf32>
    %69 = vector.shape_cast %68 : vector<8x8x8xf32> to vector<2x4x8x8xf32>
    %70 = vector.extract_strided_slice %69 {offsets = [0, 0, 0, 0], sizes = [2, 1, 8, 8], strides = [1, 1, 1, 1]} : vector<2x4x8x8xf32> to vector<2x1x8x8xf32>
    %71 = vector.shape_cast %70 : vector<2x1x8x8xf32> to vector<2x8x8xf32>
    %72 = vector.shape_cast %71 : vector<2x8x8xf32> to vector<16x8xf32>
    %73 = vector.extract_strided_slice %69 {offsets = [0, 1, 0, 0], sizes = [2, 1, 8, 8], strides = [1, 1, 1, 1]} : vector<2x4x8x8xf32> to vector<2x1x8x8xf32>
    %74 = vector.shape_cast %73 : vector<2x1x8x8xf32> to vector<2x8x8xf32>
    %75 = vector.shape_cast %74 : vector<2x8x8xf32> to vector<16x8xf32>
    %76 = vector.extract_strided_slice %69 {offsets = [0, 2, 0, 0], sizes = [2, 1, 8, 8], strides = [1, 1, 1, 1]} : vector<2x4x8x8xf32> to vector<2x1x8x8xf32>
    %77 = vector.shape_cast %76 : vector<2x1x8x8xf32> to vector<2x8x8xf32>
    %78 = vector.shape_cast %77 : vector<2x8x8xf32> to vector<16x8xf32>
    %79 = vector.extract_strided_slice %69 {offsets = [0, 3, 0, 0], sizes = [2, 1, 8, 8], strides = [1, 1, 1, 1]} : vector<2x4x8x8xf32> to vector<2x1x8x8xf32>
    %80 = vector.shape_cast %79 : vector<2x1x8x8xf32> to vector<2x8x8xf32>
    %81 = vector.shape_cast %80 : vector<2x8x8xf32> to vector<16x8xf32>
    %82 = tpu.concatenate %72, %75, %78, %81 in 1 : vector<16x8xf32>, vector<16x8xf32>, vector<16x8xf32>, vector<16x8xf32> -> vector<16x32xf32>
    %c0_14 = arith.constant 0 : index
    %c0_15 = arith.constant 0 : index
    %83 = vector.load %arg6[%c0_14, %c0_15] : memref<32x32xf32, #tpu.memory_space<vmem>>, vector<32x32xf32>
    %cst_16 = arith.constant dense<0.000000e+00> : vector<16x32xf32>
    %84 = tpu.matmul %82, %83, %cst_16 {dimension_numbers = #tpu.dot_dimension_numbers<[1], [0], [0], [1], [0, 0, 1, 1], [], []>} : vector<16x32xf32>, vector<32x32xf32>, vector<16x32xf32> -> vector<16x32xf32>
    %c0_17 = arith.constant 0 : index
    %c0_18 = arith.constant 0 : index
    %85 = vector.load %arg7[%c0_17, %c0_18] : memref<1x32xf32, #tpu.memory_space<vmem>>, vector<1x32xf32>
    %86 = vector.broadcast %85 : vector<1x32xf32> to vector<16x32xf32>
    %87 = arith.addf %84, %86 : vector<16x32xf32>
    %88 = vector.shape_cast %87 : vector<16x32xf32> to vector<2x8x32xf32>
    %c0_19 = arith.constant 0 : index
    %c0_20 = arith.constant 0 : index
    %c0_21 = arith.constant 0 : index
    %89 = vector.load %arg8[%c0_19, %c0_20, %c0_21] : memref<2x8x32xf32, #tpu.memory_space<vmem>>, vector<2x8x32xf32>
    tpu.vector_store %arg8[%c0_19, %c0_20, %c0_21], %88 {strides = array<i32>} : memref<2x8x32xf32, #tpu.memory_space<vmem>>, vector<2x8x32xf32>,
    return
  }
  func.func @transform_0(%arg0: i32) -> (i32, i32) {
    %c0_i32 = arith.constant 0 : i32
    %c0_i32_0 = arith.constant 0 : i32
    %c0_i32_1 = arith.constant 0 : i32
    return %c0_i32, %c0_i32_0 : i32, i32
  }
  func.func @transform_1(%arg0: i32) -> (i32, i32) {
    %c0_i32 = arith.constant 0 : i32
    %c0_i32_0 = arith.constant 0 : i32
    %c0_i32_1 = arith.constant 0 : i32
    return %c0_i32, %c0_i32_0 : i32, i32
  }
  func.func @transform_2(%arg0: i32) -> (i32, i32, i32) {
    %c0_i32 = arith.constant 0 : i32
    %c0_i32_0 = arith.constant 0 : i32
    %c0_i32_1 = arith.constant 0 : i32
    return %arg0, %c0_i32, %c0_i32_0 : i32, i32, i32
  }
  func.func @transform_3(%arg0: i32) -> (i32, i32) {
    %c0_i32 = arith.constant 0 : i32
    %c0_i32_0 = arith.constant 0 : i32
    %c0_i32_1 = arith.constant 0 : i32
    return %c0_i32, %c0_i32_0 : i32, i32
  }
  func.func @transform_4(%arg0: i32) -> (i32, i32) {
    %c0_i32 = arith.constant 0 : i32
    %c0_i32_0 = arith.constant 0 : i32
    %c0_i32_1 = arith.constant 0 : i32
    return %c0_i32, %c0_i32_0 : i32, i32
  }
  func.func @transform_5(%arg0: i32) -> (i32, i32) {
    %c0_i32 = arith.constant 0 : i32
    %c0_i32_0 = arith.constant 0 : i32
    %c0_i32_1 = arith.constant 0 : i32
    return %c0_i32, %c0_i32_0 : i32, i32
  }
  func.func @transform_6(%arg0: i32) -> (i32, i32) {
    %c0_i32 = arith.constant 0 : i32
    %c0_i32_0 = arith.constant 0 : i32
    %c0_i32_1 = arith.constant 0 : i32
    return %c0_i32, %c0_i32_0 : i32, i32
  }
  func.func @transform_7(%arg0: i32) -> (i32, i32, i32) {
    %c0_i32 = arith.constant 0 : i32
    %c0_i32_0 = arith.constant 0 : i32
    %c0_i32_1 = arith.constant 0 : i32
    return %arg0, %c0_i32, %c0_i32_0 : i32, i32, i32
  }
}

</mosaic_0001>

<bundles_post_ra>
// kernel: tpu_custom_call.1
= control target key start
LH: loop header
LB: loop body
LE: loop exit
PB: predicated region body
PF: predicated region fallthrough
CT: control target
= control target key end

     0   :  { %12 = vsyncpa [#allocation3], 0  ;;  %s2600_s0 = inlined_call_operand.hbm [shape: f32[8,8], index: 0, kind: input, shape index: {}]   ;;  %s2601_s1 = inlined_call_operand.hbm [shape: f32[8,8], index: 1, kind: input, shape index: {}]   ;;  %s2602_s2 = inlined_call_operand.hbm [shape: f32[2,8,32], index: 2, kind: input, shape index: {}]   ;;  %s2603_s3 = inlined_call_operand.hbm [shape: f32[32,96], index: 3, kind: input, shape index: {}]   ;;  %s2604_s4 = inlined_call_operand.vmem [shape: f32[1,96], index: 4, kind: input, shape index: {}]   ;;  %s2605_s5 = inlined_call_operand.hbm [shape: f32[32,32], index: 5, kind: input, shape index: {}]   ;;  %s2606_s6 = inlined_call_operand.vmem [shape: f32[1,32], index: 6, kind: input, shape index: {}]   ;;  %s2607_s7 = inlined_call_operand.hbm [shape: f32[2,8,32], index: 7, kind: output, shape index: {}]  }
   0x1   :  { %13 = vsyncpa [#allocation6], 0 }
   0x2   :  { %14 = vsyncpa [#allocation9], 0 }
   0x3   :  { %15 = vsyncpa [#allocation4], 0  ;;  %s2229_s24 = smov [#allocation5]  }
   0x4   :  { %s32_s25 = sshll.u32 %s2229_s24, 4  ;;  %s33_s25 = int_to_ptr.vmem [resolvable:$true] %s32_s25 }
   0x5   :  { %s2109_s26 = scalar_lea.vmem %s33_s25, 128  ;;  %p2114_p1 = scmp.lt.s32.totalorder %s33_s25, %s33_s25 }
   0x6   :  { %p2110_p0 = scmp.ne.s32.totalorder %s33_s25, %s2109_s26  ;;  %p2115_p2 = scmp.lt.s32.totalorder %s2109_s26, %s2109_s26 }
   0x8   :  { %p2116_p3 = por %p2115_p2, %p2114_p1 }
   0xa   :  { %p2117_p4 = pnand %p2116_p3, %p2110_p0 }
   0xc   :  { %2120 = shalt.err (!%p2117_p4)
}
   0xd   :  { %35 = dma.hbm_to_vmem [thread:$0]  %s2601_s1, 128, %s33_s25, [#allocation6]  }
   0xe   :  { %s2230_s29 = smov [#allocation8]   ;;  %s2231_s8 = smov [#allocation2]  }
   0xf   :  { %s53_s30 = sshll.u32 %s2230_s29, 4  ;;  %s22_s9 = sshll.u32 %s2231_s8, 4  ;;  %s54_s30 = int_to_ptr.vmem [resolvable:$true] %s53_s30  ;;  %s23_s9 = int_to_ptr.vmem [resolvable:$true] %s22_s9 }
  0x10   :  { %s2129_s10 = scalar_lea.vmem %s54_s30, 512  ;;  %p2134_p6 = scmp.lt.s32.totalorder %s54_s30, %s54_s30 }
  0x11   :  { %p2130_p5 = scmp.ne.s32.totalorder %s54_s30, %s2129_s10  ;;  %p2135_p7 = scmp.lt.s32.totalorder %s2129_s10, %s2129_s10 }
  0x13   :  { %p2136_p8 = por %p2135_p7, %p2134_p6 }
  0x15   :  { %p2137_p9 = pnand %p2136_p8, %p2130_p5 }
  0x17   :  { %2140 = shalt.err (!%p2137_p9)
}
  0x18   :  { %s2232_s11 = smov 128   ;;  %s2233_s12 = smov 8  }
  0x19   :  { %59 = dma.hbm_to_vmem [thread:$0]  %s2603_s3, 512, %s54_s30, [#allocation9], %s2232_s11, %s2232_s11, %s2233_s12  }
  0x1a   :  { %s2149_s1 = scalar_lea.vmem %s23_s9, 128  ;;  %p2154_p11 = scmp.lt.s32.totalorder %s23_s9, %s23_s9 }
  0x1b   :  { %p2150_p10 = scmp.ne.s32.totalorder %s23_s9, %s2149_s1  ;;  %p2155_p12 = scmp.lt.s32.totalorder %s2149_s1, %s2149_s1 }
  0x1d   :  { %p2156_p13 = por %p2155_p12, %p2154_p11 }
  0x1f   :  { %p2157_p0 = pnand %p2156_p13, %p2150_p10 }
  0x21   :  { %2160 = shalt.err (!%p2157_p0)
}
  0x22   :  { %25 = dma.hbm_to_vmem [thread:$0]  %s2600_s0, 128, %s23_s9, [#allocation3]  }
  0x23   :  { %s2234_s17 = smov [#allocation7]   ;;  %s2235_s19 = smov [#allocation10]  }
  0x24   :  { %s41_s18 = sshll.u32 %s2234_s17, 4  ;;  %s67_s20 = sshll.u32 %s2235_s19, 4  ;;  %s42_s18 = int_to_ptr.vmem [resolvable:$true] %s41_s18  ;;  %s68_s20 = int_to_ptr.vmem [resolvable:$true] %s67_s20 }
  0x25   :  { %s2169_s21 = scalar_lea.vmem %s42_s18, 256  ;;  %p2174_p2 = scmp.lt.s32.totalorder %s42_s18, %s42_s18 }
  0x26   :  { %p2170_p1 = scmp.ne.s32.totalorder %s42_s18, %s2169_s21  ;;  %p2175_p3 = scmp.lt.s32.totalorder %s2169_s21, %s2169_s21 }
  0x28   :  { %p2176_p4 = por %p2175_p3, %p2174_p2 }
  0x2a   :  { %p2177_p5 = pnand %p2176_p4, %p2170_p1 }
  0x2c   :  { %2180 = shalt.err (!%p2177_p5)
}
  0x2d   :  { %47 = dma.hbm_to_vmem [thread:$0]  %s2602_s2, 256, %s42_s18, [#allocation6], %s2232_s11, %s2232_s11, %s2233_s12  }
  0x2e   :  { %s2189_s0 = scalar_lea.vmem %s68_s20, 512  ;;  %p2194_p7 = scmp.lt.s32.totalorder %s68_s20, %s68_s20 }
  0x2f   :  { %p2190_p6 = scmp.ne.s32.totalorder %s68_s20, %s2189_s0  ;;  %p2195_p8 = scmp.lt.s32.totalorder %s2189_s0, %s2189_s0 }
  0x31   :  { %p2196_p9 = por %p2195_p8, %p2194_p7 }
  0x33   :  { %p2197_p10 = pnand %p2196_p9, %p2190_p6 }
  0x35   :  { %2200 = shalt.err (!%p2197_p10)
}
  0x36   :  { %73 = dma.hbm_to_vmem [thread:$0]  %s2605_s5, 512, %s68_s20, [#allocation9], %s2232_s11, %s2232_s11, %s2233_s12  }
  0x37   :  { %2221 = dma.done.wait [#allocation3], 128  }
  0x38   :  { %2222 = vsyncadd [#allocation3], 4294967168 }
  0x39   :  { %2223 = dma.done.wait [#allocation6], 384  }
  0x3a   :  { %2224 = vsyncadd [#allocation6], 4294966912 }
  0x3b   :  { %2225 = dma.done.wait [#allocation9], 1024  }
  0x3c   :  { %2226 = vsyncadd [#allocation9], 4294966272  ;;  %vm104_vm0 = vcmask 261120   ;;  %v96_v0 = vld [vmem:[#allocation8 + $0x18] sm:$0xff]  ;;  %v95_v1 = vld [vmem:[#allocation8 + $0x10] sm:$0xff]  ;;  %s2236_s25 = smov 104  }
  0x3d   :  { %1945 = vmatprep.subr.mxu0 %v96_v0  ;;  %v91_v2 = vld [vmem:[#allocation7] sm:$0xff]  ;;  %v94_v3 = vld [vmem:[#allocation8 + $0x8] sm:$0xff]  ;;  %v93_v4 = vld [vmem:[#allocation8] sm:$0xff]  ;;  %s2237_s26 = smov 120   ;;  %s2238_s27 = smov 112   ;;  %vm264_vm1 = vcmask 31744  }
  0x3e   :  { %1946 = vmatpush3.msra.mxu0 %v96_v0  ;;  %1953 = vmatprep.mubr.msk.f32.mxu0 %vm104_vm0, %v91_v2  ;;  %v92_v5 = vld [vmem:[#allocation7 + $0x8] sm:$0xff]  ;;  %v1871_v7 = vld [vmem:[%s2604_s4] ss:$0 sm:$0xff]  ;;  %s2239_s4 = smov 100   ;;  %s2240_s28 = smov 92   ;;  %v2363_v25 = vld [vmem:[#allocation5] sm:$0xff] }
  0x3f   :  { %1947 = vmatprep.subr.mxu0 %v95_v1  ;;  %v2360_v23 = vld [vmem:[#allocation2] sm:$0xff]  ;;  %s2241_s29 = smov 32   ;;  %s2242_s30 = smov 124   ;;  %v2244_v51 = vmov 0.0   ;;  %vm2245_vm2 = vmmov 0   ;;  %vm408_vm3 = vcmask 64512  }
  0x40   :  { %1948 = vmatpush3.msra.mxu0 %v95_v1  ;;  %s2243_s8 = smov 4   ;;  %1956 = vmatprep.subr.mxu1 %v2244_v51  ;;  %s2246_s9 = smov 96   ;;  %vm1752_vm4 = vcmask 130048   ;;  %vm1755_vm5 = vcmask 195584  }
  0x41   :  { %1949 = vmatprep.subr.mxu0 %v94_v3  ;;  %1958 = vmatprep.mubr.msk.f32.mxu1 %vm2245_vm2, %v2244_v51  ;;  %s2247_s10 = smov 64   ;;  %s2248_s13 = smov 16  }
  0x42   :  { %1950 = vmatpush3.msra.mxu0 %v94_v3  ;;  %s2249_s14 = smov 24   ;;  %s2250_s16 = smov [#allocation11]  }
  0x43   :  { %1951 = vmatprep.subr.mxu0 %v93_v4  ;;  %s1857_s17 = sshll.u32 %s2250_s16, 4  ;;  %s1858_s17 = int_to_ptr.vmem [resolvable:$true] %s1857_s17 }
  0x44   :  { %1952 = vmatpush3.msra.mxu0 %v93_v4  ;;  %s2201_s18 = scalar_lea.vmem %s1858_s17, 256  ;;  %p2206_p12 = scmp.lt.s32.totalorder %s1858_s17, %s1858_s17 }
  0x45   :  { %1954 = vmatmul.mubr.msk.f32.vlgmr.msra.gmra.mxu0 %vm104_vm0, %v92_v5  ;;  %1976 = vmatprep.subr.mxu0 %v2244_v51  ;;  %p2202_p11 = scmp.ne.s32.totalorder %s1858_s17, %s2201_s18  ;;  %p2207_p13 = scmp.lt.s32.totalorder %s2201_s18, %s2201_s18 }
  0x46   :  { %1978 = vmatprep.mubr.msk.f32.mxu0 %vm2245_vm2, %v2244_v51 }
  0x47   :  { %p2208_p0 = por %p2207_p13, %p2206_p12 }
  0x49   :  { %p2209_p1 = pnand %p2208_p0, %p2202_p11 }
 0x105   :  { %v1955_v6 = vpop.f32.mrf.mxu0 }
 0x106   :  { %v2324_v10 = vadd.f32 %v1955_v6, %v1871_v7 }
 0x107   :  { %v177_v8 = vpop.f32.mrf.mxu0 }
 0x108   :  { %v2320_v9 = vadd.f32 %v1871_v7, %v177_v8 }
 0x10a   :  { %200 = vrot.lane.b32.xlu1 %v2320_v9, %s2236_s25  ;;  %188 = vrot.lane.b32.xlu0 %v2320_v9, %s2237_s26 }
 0x10e   :  { %190 = vrot.lane.b32.xlu1 %v2324_v10, %s2237_s26  ;;  %194 = vrot.lane.b32.xlu0 %v2320_v9, %s2238_s27 }
 0x112   :  { %202 = vrot.lane.b32.xlu1 %v2324_v10, %s2236_s25  ;;  %196 = vrot.lane.b32.xlu0 %v2324_v10, %s2238_s27 }
 0x116   :  { %333 = vrot.lane.b32.xlu1 %v2324_v10, %s2239_s4  ;;  %309 = vrot.lane.b32.xlu0 %v2324_v10, %s2240_s28 }
 0x11a   :  { %325 = vrot.lane.b32.xlu1 %v2320_v9, %s2239_s4  ;;  %301 = vrot.lane.b32.xlu0 %v2320_v9, %s2240_s28 }
 0x17c   :  { %v2334_v11 = vpop.permute.xlu1 %200  ;;  %v2336_v12 = vpop.permute.xlu0 %188 }
 0x180   :  { %v2338_v13 = vpop.permute.xlu1 %190  ;;  %v2340_v14 = vpop.permute.xlu0 %194 }
 0x181   :  { %335 = vrot.lane.b32.xlu1 %v2338_v13, %s2239_s4  ;;  %311 = vrot.lane.b32.xlu0 %v2338_v13, %s2240_s28 }
 0x184   :  { %v2344_v15 = vpop.permute.xlu1 %202  ;;  %v2346_v16 = vpop.permute.xlu0 %196 }
 0x185   :  { %327 = vrot.lane.b32.xlu1 %v2336_v12, %s2239_s4  ;;  %303 = vrot.lane.b32.xlu0 %v2336_v12, %s2240_s28 }
 0x188   :  { %v334_v17 = vpop.permute.xlu1 %333  ;;  %v310_v18 = vpop.permute.xlu0 %309 }
 0x189   :  { %v353_v19 = vsel %vm264_vm1, %v310_v18, %v334_v17  ;;  %329 = vrot.lane.b32.xlu1 %v2340_v14, %s2239_s4  ;;  %305 = vrot.lane.b32.xlu0 %v2340_v14, %s2240_s28 }
 0x18a   :  { %v361_v39 = vmul.f32 %v353_v19, %v2360_v23 }
 0x18c   :  { %v326_v20 = vpop.permute.xlu1 %325  ;;  %v302_v21 = vpop.permute.xlu0 %301 }
 0x18d   :  { %331 = vrot.lane.b32.xlu1 %v2334_v11, %s2239_s4  ;;  %307 = vrot.lane.b32.xlu0 %v2334_v11, %s2240_s28  ;;  %v349_v22 = vsel %vm264_vm1, %v302_v21, %v326_v20 }
 0x18e   :  { %v357_v24 = vmul.f32 %v349_v22, %v2360_v23 }
 0x191   :  { %337 = vrot.lane.b32.xlu1 %v2346_v16, %s2239_s4  ;;  %313 = vrot.lane.b32.xlu0 %v2346_v16, %s2240_s28 }
 0x195   :  { %339 = vrot.lane.b32.xlu1 %v2344_v15, %s2239_s4  ;;  %315 = vrot.lane.b32.xlu0 %v2344_v15, %s2240_s28 }
 0x199   :  { %290 = vrot.lane.b32.xlu0 %v2363_v25, %s2241_s29  ;;  %373 = vrot.lane.b32.xlu1 %v357_v24, %s2241_s29 }
 0x1f3   :  { %v336_v26 = vpop.permute.xlu1 %335  ;;  %v312_v27 = vpop.permute.xlu0 %311 }
 0x1f4   :  { %v354_v41 = vsel %vm264_vm1, %v312_v27, %v336_v26 }
 0x1f5   :  { %v362_v45 = vmul.f32 %v354_v41, %v2360_v23 }
 0x1f7   :  { %v328_v28 = vpop.permute.xlu1 %327  ;;  %v304_v29 = vpop.permute.xlu0 %303 }
 0x1f8   :  { %v350_v30 = vsel %vm264_vm1, %v304_v29, %v328_v28 }
 0x1f9   :  { %v358_v31 = vmul.f32 %v350_v30, %v2360_v23 }
 0x1fb   :  { %v330_v32 = vpop.permute.xlu1 %329  ;;  %375 = vrot.lane.b32.xlu0 %v358_v31, %s2241_s29  ;;  %v306_v33 = vpop.permute.xlu0 %305 }
 0x1fc   :  { %v351_v34 = vsel %vm264_vm1, %v306_v33, %v330_v32  ;;  %v208_v32 = vmul.f32 %v2363_v25, %v2320_v9 }
 0x1fd   :  { %v359_v35 = vmul.f32 %v351_v34, %v2360_v23 }
 0x1ff   :  { %v332_v36 = vpop.permute.xlu1 %331  ;;  %377 = vrot.lane.b32.xlu1 %v359_v35, %s2241_s29  ;;  %v308_v37 = vpop.permute.xlu0 %307 }
 0x200   :  { %v352_v38 = vsel %vm264_vm1, %v308_v37, %v332_v36 }
 0x201   :  { %v360_v40 = vmul.f32 %v352_v38, %v2360_v23 }
 0x203   :  { %v338_v42 = vpop.permute.xlu1 %337  ;;  %381 = vrot.lane.b32.xlu1 %v361_v39, %s2241_s29  ;;  %379 = vrot.lane.b32.xlu0 %v360_v40, %s2241_s29  ;;  %v314_v43 = vpop.permute.xlu0 %313 }
 0x204   :  { %v355_v44 = vsel %vm264_vm1, %v314_v43, %v338_v42 }
 0x205   :  { %v363_v46 = vmul.f32 %v355_v44, %v2360_v23 }
 0x207   :  { %v340_v47 = vpop.permute.xlu1 %339  ;;  %383 = vrot.lane.b32.xlu0 %v362_v45, %s2241_s29  ;;  %385 = vrot.lane.b32.xlu1 %v363_v46, %s2241_s29  ;;  %v316_v48 = vpop.permute.xlu0 %315 }
 0x208   :  { %v356_v49 = vsel %vm264_vm1, %v316_v48, %v340_v47 }
 0x209   :  { %v364_v50 = vmul.f32 %v356_v49, %v2360_v23  ;;  %v209_v49 = vmul.f32 %v2363_v25, %v2336_v12 }
 0x20b   :  { %216 = vrot.lane.b32.xlu1 %v2320_v9, %s2242_s30  ;;  %387 = vrot.lane.b32.xlu0 %v364_v50, %s2241_s29  ;;  %v291_v52 = vpop.permute.xlu0 %290  ;;  %v374_v54 = vpop.permute.xlu1 %373 }
 0x20c   :  { %v293_v53 = vmul.f32 %v291_v52, %v2320_v9  ;;  %v297_v58 = vmul.f32 %v291_v52, %v2324_v10  ;;  %v295_v62 = vmul.f32 %v291_v52, %v2340_v14  ;;  %v298_v63 = vmul.f32 %v291_v52, %v2338_v13 }
 0x20d   :  { %v294_v4 = vmul.f32 %v291_v52, %v2336_v12  ;;  %v296_v8 = vmul.f32 %v291_v52, %v2334_v11  ;;  %v299_v17 = vmul.f32 %v291_v52, %v2346_v16  ;;  %v300_v24 = vmul.f32 %v291_v52, %v2344_v15 }
 0x20e   :  { %v397_v55 = vadd.f32 %v374_v54, %v293_v53 }
 0x20f   :  { %242 = vrot.lane.b32.xlu1 %v2336_v12, %s2243_s8  ;;  %240 = vrot.lane.b32.xlu0 %v2320_v9, %s2243_s8 }
 0x213   :  { %220 = vrot.lane.b32.xlu1 %v2340_v14, %s2242_s30  ;;  %218 = vrot.lane.b32.xlu0 %v2336_v12, %s2242_s30 }
 0x217   :  { %246 = vrot.lane.b32.xlu1 %v2334_v11, %s2243_s8  ;;  %244 = vrot.lane.b32.xlu0 %v2340_v14, %s2243_s8 }
 0x21b   :  { %224 = vrot.lane.b32.xlu1 %v2324_v10, %s2242_s30  ;;  %222 = vrot.lane.b32.xlu0 %v2334_v11, %s2242_s30 }
 0x21f   :  { %226 = vrot.lane.b32.xlu1 %v2338_v13, %s2242_s30  ;;  %248 = vrot.lane.b32.xlu0 %v2324_v10, %s2243_s8 }
 0x223   :  { %250 = vrot.lane.b32.xlu0 %v2338_v13, %s2243_s8  ;;  %406 = vrot.lane.b32.xlu1 %v397_v55, %s2246_s9 }
 0x26d   :  { %v376_v56 = vpop.permute.xlu0 %375 }
 0x26e   :  { %v398_v6 = vadd.f32 %v376_v56, %v294_v4  ;;  %v210_v56 = vmul.f32 %v2363_v25, %v2340_v14 }
 0x271   :  { %v378_v57 = vpop.permute.xlu1 %377 }
 0x272   :  { %v399_v2 = vadd.f32 %v378_v57, %v295_v62  ;;  %v211_v62 = vmul.f32 %v2363_v25, %v2334_v11 }
 0x275   :  { %v382_v59 = vpop.permute.xlu1 %381  ;;  %v380_v60 = vpop.permute.xlu0 %379 }
 0x276   :  { %v401_v61 = vadd.f32 %v382_v59, %v297_v58  ;;  %v400_v19 = vadd.f32 %v380_v60, %v296_v8 }
 0x278   :  { %719 = vrot.lane.b32.xlu1 %v401_v61, %s2246_s9 }
 0x279   :  { %v386_v0 = vpop.permute.xlu1 %385  ;;  %v384_v1 = vpop.permute.xlu0 %383 }
 0x27a   :  { %v402_v3 = vadd.f32 %v384_v1, %v298_v63  ;;  %v403_v20 = vadd.f32 %v386_v0, %v299_v17  ;;  %v214_v63 = vmul.f32 %v2363_v25, %v2346_v16 }
 0x27c   :  { %563 = vrot.lane.b32.xlu1 %v399_v2, %s2246_s9  ;;  %797 = vrot.lane.b32.xlu0 %v402_v3, %s2246_s9 }
 0x27d   :  { %v217_v5 = vpop.permute.xlu1 %216  ;;  %v388_v21 = vpop.permute.xlu0 %387 }
 0x27e   :  { %v404_v28 = vadd.f32 %v388_v21, %v300_v24 }
 0x280   :  { %228 = vrot.lane.b32.xlu1 %v2346_v16, %s2242_s30  ;;  %485 = vrot.lane.b32.xlu0 %v398_v6, %s2246_s9 }
 0x281   :  { %v243_v7 = vpop.permute.xlu1 %242  ;;  %v241_v26 = vpop.permute.xlu0 %240 }
 0x282   :  { %v265_v29 = vsel %vm264_vm1, %v217_v5, %v241_v26  ;;  %v213_v5 = vmul.f32 %v2363_v25, %v2338_v13 }
 0x283   :  { %v273_v31 = vmul.f32 %v265_v29, %v2360_v23 }
 0x284   :  { %230 = vrot.lane.b32.xlu1 %v2344_v15, %s2242_s30  ;;  %252 = vrot.lane.b32.xlu0 %v2346_v16, %s2243_s8 }
 0x285   :  { %v221_v18 = vpop.permute.xlu1 %220  ;;  %v281_v34 = vadd.f32 %v273_v31, %v208_v32  ;;  %v219_v35 = vpop.permute.xlu0 %218 }
 0x286   :  { %v266_v44 = vsel %vm264_vm1, %v219_v35, %v243_v7 }
 0x287   :  { %v274_v47 = vmul.f32 %v266_v44, %v2360_v23 }
 0x288   :  { %875 = vrot.lane.b32.xlu1 %v403_v20, %s2246_s9  ;;  %641 = vrot.lane.b32.xlu0 %v400_v19, %s2246_s9 }
 0x289   :  { %v247_v22 = vpop.permute.xlu1 %246  ;;  %v245_v36 = vpop.permute.xlu0 %244  ;;  %v282_v53 = vadd.f32 %v274_v47, %v209_v49 }
 0x28a   :  { %v267_v48 = vsel %vm264_vm1, %v221_v18, %v245_v36  ;;  %v215_v18 = vmul.f32 %v2363_v25, %v2344_v15 }
 0x28b   :  { %v275_v54 = vmul.f32 %v267_v48, %v2360_v23 }
 0x28c   :  { %1178 = vrot.lane.b32.xlu1 %v2336_v12, %s2247_s10  ;;  %254 = vrot.lane.b32.xlu0 %v2344_v15, %s2243_s8 }
 0x28d   :  { %v225_v27 = vpop.permute.xlu1 %224  ;;  %v223_v37 = vpop.permute.xlu0 %222  ;;  %v283_v59 = vadd.f32 %v275_v54, %v210_v56 }
 0x28e   :  { %v268_v55 = vsel %vm264_vm1, %v223_v37, %v247_v22 }
 0x28f   :  { %v276_v60 = vmul.f32 %v268_v55, %v2360_v23 }
 0x290   :  { %1254 = vrot.lane.b32.xlu1 %v2340_v14, %s2247_s10  ;;  %953 = vrot.lane.b32.xlu0 %v404_v28, %s2246_s9 }
 0x291   :  { %v227_v30 = vpop.permute.xlu1 %226  ;;  %v249_v38 = vpop.permute.xlu0 %248  ;;  %v284_v2 = vadd.f32 %v276_v60, %v211_v62 }
 0x292   :  { %v269_v39 = vsel %vm264_vm1, %v225_v27, %v249_v38 }
 0x293   :  { %v277_v40 = vmul.f32 %v269_v39, %v2360_v23 }
 0x294   :  { %1102 = vrot.lane.b32.xlu0 %v2320_v9, %s2247_s10  ;;  %v212_v9 = vmul.f32 %v2363_v25, %v2324_v10 }
 0x295   :  { %v407_v33 = vpop.permute.xlu1 %406  ;;  %v251_v41 = vpop.permute.xlu0 %250 }
 0x296   :  { %1957 = vmatpush3.xpose.msk.msra.mxu1 %vm408_vm3, %v407_v33  ;;  %v285_v43 = vadd.f32 %v277_v40, %v212_v9  ;;  %v270_v14 = vsel %vm264_vm1, %v227_v30, %v251_v41 }
 0x297   :  { %1961 = vmatprep.subr.mxu1 %v2244_v51  ;;  %v278_v3 = vmul.f32 %v270_v14, %v2360_v23 }
 0x299   :  { %1959 = vmatmul.mubr.msk.f32.vlgmr.msra.gmra.mxu1 %vm408_vm3, %v281_v34  ;;  %v286_v8 = vadd.f32 %v278_v3, %v213_v5 }
 0x29a   :  { %1963 = vmatprep.mubr.msk.f32.mxu1 %vm2245_vm2, %v2244_v51 }
 0x2ea   :  { %v720_v42 = vpop.permute.xlu1 %719 }
 0x2eb   :  { %1977 = vmatpush3.xpose.msk.msra.mxu0 %vm408_vm3, %v720_v42 }
 0x2ec   :  { %1986 = vmatprep.subr.mxu0 %v2244_v51 }
 0x2ee   :  { %v564_v45 = vpop.permute.xlu1 %563  ;;  %1979 = vmatmul.mubr.msk.f32.vlgmr.msra.gmra.mxu0 %vm408_vm3, %v285_v43  ;;  %v798_v46 = vpop.permute.xlu0 %797 }
 0x2ef   :  { %1988 = vmatprep.mubr.msk.f32.mxu0 %vm2245_vm2, %v2244_v51 }
 0x2f2   :  { %v229_v50 = vpop.permute.xlu1 %228  ;;  %v486_v52 = vpop.permute.xlu0 %485 }
 0x2f3   :  { %1962 = vmatpush3.xpose.msk.msra.mxu1 %vm408_vm3, %v486_v52 }
 0x2f4   :  { %1966 = vmatprep.subr.mxu1 %v2244_v51 }
 0x2f6   :  { %v231_v57 = vpop.permute.xlu1 %230  ;;  %v253_v58 = vpop.permute.xlu0 %252  ;;  %1964 = vmatmul.mubr.msk.f32.vlgmr.msra.gmra.mxu1 %vm408_vm3, %v282_v53 }
 0x2f7   :  { %v271_v12 = vsel %vm264_vm1, %v229_v50, %v253_v58  ;;  %1967 = vmatpush3.xpose.msk.msra.mxu1 %vm408_vm3, %v564_v45  ;;  %1968 = vmatprep.mubr.msk.f32.mxu1 %vm2245_vm2, %v2244_v51 }
 0x2f8   :  { %v279_v61 = vmul.f32 %v271_v12, %v2360_v23  ;;  %1971 = vmatprep.subr.mxu1 %v2244_v51 }
 0x2fa   :  { %v876_v0 = vpop.permute.xlu1 %875  ;;  %v642_v1 = vpop.permute.xlu0 %641  ;;  %1969 = vmatmul.mubr.msk.f32.vlgmr.msra.gmra.mxu1 %vm408_vm3, %v283_v59  ;;  %v287_v4 = vadd.f32 %v279_v61, %v214_v63 }
 0x2fb   :  { %1972 = vmatpush3.xpose.msk.msra.mxu1 %vm408_vm3, %v642_v1  ;;  %1987 = vmatpush3.xpose.msk.msra.mxu0 %vm408_vm3, %v876_v0 }
 0x2fc   :  { %1973 = vmatprep.mubr.msk.f32.mxu1 %vm2245_vm2, %v2244_v51  ;;  %1981 = vmatprep.subr.mxu1 %v2244_v51 }
 0x2fd   :  { %1996 = vmatprep.subr.mxu0 %v2244_v51 }
 0x2fe   :  { %1989 = vmatmul.mubr.msk.f32.vlgmr.msra.gmra.mxu0 %vm408_vm3, %v287_v4  ;;  %v255_v6 = vpop.permute.xlu0 %254  ;;  %1974 = vmatmul.mubr.msk.f32.vlgmr.msra.gmra.mxu1 %vm408_vm3, %v284_v2 }
 0x2ff   :  { %v272_v7 = vsel %vm264_vm1, %v231_v57, %v255_v6  ;;  %1982 = vmatpush3.xpose.msk.msra.mxu1 %vm408_vm3, %v798_v46  ;;  %1983 = vmatprep.mubr.msk.f32.mxu1 %vm2245_vm2, %v2244_v51 }
 0x300   :  { %v280_v17 = vmul.f32 %v272_v7, %v2360_v23  ;;  %1991 = vmatprep.subr.mxu1 %v2244_v51  ;;  %1998 = vmatprep.mubr.msk.f32.mxu0 %vm2245_vm2, %v2244_v51  ;;  %v1179_v23 = vpop.permute.xlu1 %1178 }
 0x302   :  { %v954_v19 = vpop.permute.xlu0 %953  ;;  %1984 = vmatmul.mubr.msk.f32.vlgmr.msra.gmra.mxu1 %vm408_vm3, %v286_v8  ;;  %v288_v20 = vadd.f32 %v280_v17, %v215_v18 }
 0x303   :  { %1992 = vmatpush3.xpose.msk.msra.mxu1 %vm408_vm3, %v954_v19  ;;  %1993 = vmatprep.mubr.msk.f32.mxu1 %vm2245_vm2, %v2244_v51 }
 0x304   :  { %2001 = vmatprep.subr.mxu1 %v2244_v51  ;;  %v1255_v45 = vpop.permute.xlu1 %1254 }
 0x306   :  { %v1103_v21 = vpop.permute.xlu0 %1102  ;;  %1994 = vmatmul.mubr.msk.f32.vlgmr.msra.gmra.mxu1 %vm408_vm3, %v288_v20 }
 0x307   :  { %1997 = vmatpush3.msra.mxu0 %v1103_v21  ;;  %2002 = vmatpush3.msra.mxu1 %v1179_v23 }
 0x308   :  { %2006 = vmatprep.subr.mxu0 %v2244_v51  ;;  %2003 = vmatprep.mubr.msk.f32.mxu1 %vm2245_vm2, %v2244_v51 }
 0x309   :  { %2011 = vmatprep.subr.mxu1 %v2244_v51 }
 0x359   :  { %v480_v25 = vpop.f32.mrf.mxu1 }
 0x35a   :  { %v1030_v22 = vsel %vm408_vm3, %v480_v25, -inf }
 0x35b   :  { %1031 = vmax.xlane.f32.xlu1 %v1030_v22  ;;  %v1960_v24 = vpop.f32.mrf.mxu1 }
 0x36c   :  { %1406 = vrot.lane.b32.xlu1 %v2324_v10, %s2247_s10 }
 0x3ae   :  { %v2525_v26 = vpop.f32.mrf.mxu0 }
 0x3af   :  { %v1042_v27 = vsel %vm408_vm3, %v2525_v26, -inf }
 0x3b0   :  { %1043 = vmax.xlane.f32.xlu0 %v1042_v27  ;;  %v1980_v28 = vpop.f32.mrf.mxu0 }
 0x3b6   :  { %v558_v29 = vpop.f32.mrf.mxu1 }
 0x3b7   :  { %v1033_v39 = vsel %vm408_vm3, %v558_v29, -inf }
 0x3b8   :  { %v1965_v30 = vpop.f32.mrf.mxu1 }
 0x3ba   :  { %v636_v31 = vpop.f32.mrf.mxu1 }
 0x3bb   :  { %v1036_v42 = vsel %vm408_vm3, %v636_v31, -inf }
 0x3bc   :  { %v1970_v32 = vpop.f32.mrf.mxu1 }
 0x3be   :  { %v714_v33 = vpop.f32.mrf.mxu1  ;;  %v948_v34 = vpop.f32.mrf.mxu0 }
 0x3bf   :  { %v1048_v35 = vsel %vm408_vm3, %v948_v34, -inf  ;;  %v1039_v36 = vsel %vm408_vm3, %v714_v33, -inf }
 0x3c0   :  { %1049 = vmax.xlane.f32.xlu0 %v1048_v35  ;;  %v1990_v37 = vpop.f32.mrf.mxu0  ;;  %1040 = vmax.xlane.f32.xlu1 %v1039_v36  ;;  %v1975_v10 = vpop.f32.mrf.mxu1  ;;  %v1761_v36 = vld [vmem:[#allocation10 + $0x18] sm:$0xff] }
 0x3c1   :  { %v1760_v37 = vld [vmem:[#allocation10 + $0x10] sm:$0xff] }
 0x3c2   :  { %v870_v38 = vpop.f32.mrf.mxu1 }
 0x3c3   :  { %v1045_v40 = vsel %vm408_vm3, %v870_v38, -inf }
 0x3c4   :  { %1034 = vmax.xlane.f32.xlu0 %v1033_v39  ;;  %1046 = vmax.xlane.f32.xlu1 %v1045_v40  ;;  %v1985_v9 = vpop.f32.mrf.mxu1 }
 0x3c6   :  { %v1026_v41 = vpop.f32.mrf.mxu1 }
 0x3c7   :  { %v1051_v43 = vsel %vm408_vm3, %v1026_v41, -inf }
 0x3c8   :  { %1037 = vmax.xlane.f32.xlu0 %v1036_v42  ;;  %1052 = vmax.xlane.f32.xlu1 %v1051_v43  ;;  %v1995_v44 = vpop.f32.mrf.mxu1 }
 0x3d9   :  { %1558 = vrot.lane.b32.xlu1 %v2346_v16, %s2247_s10 }
 0x3de   :  { %1330 = vrot.lane.b32.xlu0 %v2334_v11, %s2247_s10 }
 0x3e2   :  { %1482 = vrot.lane.b32.xlu0 %v2338_v13, %s2247_s10 }
 0x3e4   :  { %v1032_v46 = vpop.xlane.xlu1 %1031 }
 0x3e5   :  { %v1054_v47 = vsub.f32 %v480_v25, %v1032_v46 }
 0x3e6   :  { %1634 = vrot.lane.b32.xlu0 %v2344_v15, %s2247_s10 }
 0x3e7   :  { %v1062_v48 = vmul.f32 1.442695, %v1054_v47 }
 0x3e8   :  { %v1407_v11 = vpop.permute.xlu1 %1406 }
 0x3e9   :  { %2069 = vpow2.f32 %v1062_v48 }
 0x3f6   :  { %v2543_v49 = vpop.eup %2069 }
 0x3f7   :  { %1999 = vmatmul.mubr.msk.f32.vlgmr.msra.gmra.mxu0 %vm408_vm3, %v2543_v49 }
 0x3f8   :  { %2007 = vmatpush3.msra.mxu0 %v1255_v45  ;;  %2008 = vmatprep.mubr.msk.f32.mxu0 %vm2245_vm2, %v2244_v51  ;;  %v1758_v45 = vld [vmem:[#allocation10] sm:$0xff] }
 0x3f9   :  { %2016 = vmatprep.subr.mxu0 %v2244_v51 }
 0x439   :  { %v1044_v13 = vpop.xlane.xlu0 %1043 }
 0x43a   :  { %v1058_v61 = vsub.f32 %v2525_v26, %v1044_v13 }
 0x43c   :  { %v1070_v1 = vmul.f32 1.442695, %v1058_v61 }
 0x449   :  { %v1050_v16 = vpop.xlane.xlu0 %1049  ;;  %v1041_v50 = vpop.xlane.xlu1 %1040 }
 0x44a   :  { %v1057_v52 = vsub.f32 %v714_v33, %v1041_v50  ;;  %v1060_v63 = vsub.f32 %v948_v34, %v1050_v16 }
 0x44c   :  { %v1068_v56 = vmul.f32 1.442695, %v1057_v52  ;;  %v1074_v2 = vmul.f32 1.442695, %v1060_v63 }
 0x44d   :  { %v1035_v53 = vpop.xlane.xlu0 %1034  ;;  %v1047_v15 = vpop.xlane.xlu1 %1046 }
 0x44e   :  { %v1055_v54 = vsub.f32 %v558_v29, %v1035_v53  ;;  %v1059_v57 = vsub.f32 %v870_v38, %v1047_v15  ;;  %v1078_v29 = vsel %vm408_vm3, %v2543_v49, 0.0 }
 0x450   :  { %v1064_v55 = vmul.f32 1.442695, %v1055_v54  ;;  %v1072_v62 = vmul.f32 1.442695, %v1059_v57 }
 0x451   :  { %v1038_v58 = vpop.xlane.xlu0 %1037  ;;  %v1053_v12 = vpop.xlane.xlu1 %1052 }
 0x452   :  { %2071 = vpow2.f32 %v1064_v55  ;;  %v1056_v59 = vsub.f32 %v636_v31, %v1038_v58  ;;  %v1061_v60 = vsub.f32 %v1026_v41, %v1053_v12  ;;  %v1759_v41 = vld [vmem:[#allocation10 + $0x8] sm:$0xff] }
 0x453   :  { %2073 = vpow2.f32 %v1068_v56 }
 0x454   :  { %v1066_v14 = vmul.f32 1.442695, %v1056_v59  ;;  %v1076_v0 = vmul.f32 1.442695, %v1061_v60 }
 0x455   :  { %v1331_v3 = vpop.permute.xlu0 %1330  ;;  %v1559_v21 = vpop.permute.xlu1 %1558 }
 0x456   :  { %2075 = vpow2.f32 %v1066_v14 }
 0x457   :  { %2077 = vpow2.f32 %v1072_v62 }
 0x458   :  { %2079 = vpow2.f32 %v1076_v0 }
 0x459   :  { %2081 = vpow2.f32 %v1070_v1  ;;  %v1483_v8 = vpop.permute.xlu0 %1482 }
 0x45a   :  { %2083 = vpow2.f32 %v1074_v2 }
 0x45d   :  { %v1635_v25 = vpop.permute.xlu0 %1634 }
 0x45f   :  { %v2072_v4 = vpop.eup %2071 }
 0x460   :  { %2004 = vmatmul.mubr.msk.f32.vlgmr.msra.gmra.mxu1 %vm408_vm3, %v2072_v4  ;;  %v1081_v5 = vsel %vm408_vm3, %v2072_v4, 0.0  ;;  %v2074_v6 = vpop.eup %2073 }
 0x461   :  { %2012 = vmatpush3.msra.mxu1 %v1331_v3  ;;  %1082 = vadd.xlane.f32.xlu1 %v1081_v5  ;;  %v1087_v18 = vsel %vm408_vm3, %v2074_v6, 0.0 }
 0x462   :  { %2013 = vmatprep.mubr.msk.f32.mxu1 %vm2245_vm2, %v2244_v51  ;;  %2021 = vmatprep.subr.mxu1 %v2244_v51 }
 0x463   :  { %v2076_v7 = vpop.eup %2075 }
 0x464   :  { %2009 = vmatmul.mubr.msk.f32.vlgmr.msra.gmra.mxu0 %vm408_vm3, %v2076_v7  ;;  %2014 = vmatmul.mubr.msk.f32.vlgmr.msra.gmra.mxu1 %vm408_vm3, %v2074_v6  ;;  %v1084_v17 = vsel %vm408_vm3, %v2076_v7, 0.0  ;;  %v2078_v19 = vpop.eup %2077 }
 0x465   :  { %2017 = vmatpush3.msra.mxu0 %v1407_v11  ;;  %2022 = vmatpush3.msra.mxu1 %v1483_v8  ;;  %v2080_v20 = vpop.eup %2079  ;;  %v1093_v22 = vsel %vm408_vm3, %v2078_v19, 0.0 }
 0x466   :  { %1085 = vadd.xlane.f32.xlu0 %v1084_v17  ;;  %1088 = vadd.xlane.f32.xlu1 %v1087_v18  ;;  %v2082_v23 = vpop.eup %2081  ;;  %v1099_v24 = vsel %vm408_vm3, %v2080_v20, 0.0 }
 0x467   :  { %2018 = vmatprep.mubr.msk.f32.mxu0 %vm2245_vm2, %v2244_v51  ;;  %2023 = vmatprep.mubr.msk.f32.mxu1 %vm2245_vm2, %v2244_v51  ;;  %v2084_v26 = vpop.eup %2083  ;;  %v1090_v28 = vsel %vm408_vm3, %v2082_v23, 0.0 }
 0x468   :  { %2026 = vmatprep.subr.mxu0 %v2244_v51  ;;  %2031 = vmatprep.subr.mxu1 %v2244_v51  ;;  %v1096_v27 = vsel %vm408_vm3, %v2084_v26, 0.0 }
 0x469   :  { %2019 = vmatmul.mubr.msk.f32.vlgmr.msra.gmra.mxu0 %vm408_vm3, %v2082_v23  ;;  %2024 = vmatmul.mubr.msk.f32.vlgmr.msra.gmra.mxu1 %vm408_vm3, %v2078_v19 }
 0x46a   :  { %2027 = vmatpush3.msra.mxu0 %v1559_v21  ;;  %2032 = vmatpush3.msra.mxu1 %v1635_v25  ;;  %v1898_v21 = vld [vmem:[%s2606_s6] ss:$0 sm:$0xff] }
 0x46b   :  { %1094 = vadd.xlane.f32.xlu0 %v1093_v22  ;;  %1100 = vadd.xlane.f32.xlu1 %v1099_v24 }
 0x46c   :  { %2028 = vmatprep.mubr.msk.f32.mxu0 %vm2245_vm2, %v2244_v51  ;;  %2033 = vmatprep.mubr.msk.f32.mxu1 %vm2245_vm2, %v2244_v51 }
 0x46d   :  { %2029 = vmatmul.mubr.msk.f32.vlgmr.msra.gmra.mxu0 %vm408_vm3, %v2084_v26  ;;  %2034 = vmatmul.mubr.msk.f32.vlgmr.msra.gmra.mxu1 %vm408_vm3, %v2080_v20 }
 0x46e   :  { %2036 = vmatprep.subr.mxu0 %v1761_v36 }
 0x46f   :  { %1097 = vadd.xlane.f32.xlu0 %v1096_v27  ;;  %1091 = vadd.xlane.f32.xlu1 %v1090_v28 }
 0x470   :  { %2037 = vmatpush3.msra.mxu0 %v1761_v36 }
 0x471   :  { %2038 = vmatprep.subr.mxu0 %v1760_v37 }
 0x472   :  { %2039 = vmatpush3.msra.mxu0 %v1760_v37 }
 0x473   :  { %1079 = vadd.xlane.f32.xlu0 %v1078_v29  ;;  %2040 = vmatprep.subr.mxu0 %v1759_v41 }
 0x474   :  { %2041 = vmatpush3.msra.mxu0 %v1759_v41 }
 0x475   :  { %2042 = vmatprep.subr.mxu0 %v1758_v45 }
 0x476   :  { %2043 = vmatpush3.msra.mxu0 %v1758_v45 }
 0x4b7   :  { %v2580_v30 = vpop.f32.mrf.mxu0 }
 0x4b9   :  { %v2000_v31 = vpop.f32.mrf.mxu0 }
 0x4ea   :  { %v1083_v32 = vpop.xlane.xlu1 %1082 }
 0x4eb   :  { %2085 = vrcp.f32 %v1083_v32 }
 0x4ef   :  { %v1086_v33 = vpop.xlane.xlu0 %1085  ;;  %v1089_v34 = vpop.xlane.xlu1 %1088 }
 0x4f0   :  { %2087 = vrcp.f32 %v1086_v33 }
 0x4f4   :  { %v1095_v51 = vpop.xlane.xlu0 %1094  ;;  %v1101_v39 = vpop.xlane.xlu1 %1100 }
 0x4f5   :  { %2089 = vrcp.f32 %v1095_v51 }
 0x4f6   :  { %2091 = vrcp.f32 %v1089_v34 }
 0x4f8   :  { %v1098_v35 = vpop.xlane.xlu0 %1097  ;;  %v2086_v10 = vpop.eup %2085 }
 0x4f9   :  { %2093 = vrcp.f32 %v1098_v35  ;;  %v1092_v14 = vpop.xlane.xlu1 %1091 }
 0x4fa   :  { %2095 = vrcp.f32 %v1101_v39 }
 0x4fc   :  { %v1080_v61 = vpop.xlane.xlu0 %1079 }
 0x4fd   :  { %v2088_v42 = vpop.eup %2087  ;;  %2097 = vrcp.f32 %v1080_v61 }
 0x4fe   :  { %2099 = vrcp.f32 %v1092_v14 }
 0x502   :  { %v2090_v49 = vpop.eup %2089 }
 0x503   :  { %v2092_v53 = vpop.eup %2091 }
 0x506   :  { %v2094_v15 = vpop.eup %2093 }
 0x507   :  { %v2096_v59 = vpop.eup %2095 }
 0x50a   :  { %v2098_v63 = vpop.eup %2097 }
 0x50b   :  { %v1718_v2 = vmul.f32 %v2098_v63, %v2580_v30  ;;  %v2100_v4 = vpop.eup %2099 }
 0x520   :  { %v1250_v38 = vpop.f32.mrf.mxu1 }
 0x521   :  { %v1719_v40 = vmul.f32 %v2086_v10, %v1250_v38 }
 0x522   :  { %v2005_v9 = vpop.f32.mrf.mxu1 }
 0x523   :  { %1728 = vrot.lane.b32.xlu0 %v1719_v40, %s2233_s12 }
 0x524   :  { %v1326_v43 = vpop.f32.mrf.mxu0  ;;  %v1402_v44 = vpop.f32.mrf.mxu1 }
 0x525   :  { %v1720_v46 = vmul.f32 %v2088_v42, %v1326_v43  ;;  %v1721_v56 = vmul.f32 %v2092_v53, %v1402_v44 }
 0x526   :  { %v2010_v47 = vpop.f32.mrf.mxu0  ;;  %v2015_v48 = vpop.f32.mrf.mxu1 }
 0x527   :  { %1736 = vrot.lane.b32.xlu1 %v1720_v46, %s2248_s13 }
 0x529   :  { %v1478_v11 = vpop.f32.mrf.mxu0  ;;  %v1554_v13 = vpop.f32.mrf.mxu1 }
 0x52a   :  { %v1723_v16 = vmul.f32 %v2090_v49, %v1554_v13  ;;  %v1722_v8 = vmul.f32 %v2100_v4, %v1478_v11 }
 0x52b   :  { %v2020_v50 = vpop.f32.mrf.mxu0  ;;  %v2025_v52 = vpop.f32.mrf.mxu1 }
 0x52c   :  { %1730 = vrot.lane.b32.xlu1 %v1723_v16, %s2233_s12 }
 0x52d   :  { %v1630_v54 = vpop.f32.mrf.mxu0  ;;  %v1706_v55 = vpop.f32.mrf.mxu1 }
 0x52e   :  { %v1724_v57 = vmul.f32 %v2094_v15, %v1630_v54  ;;  %v1725_v60 = vmul.f32 %v2096_v59, %v1706_v55 }
 0x52f   :  { %v2030_v58 = vpop.f32.mrf.mxu0  ;;  %v2035_v12 = vpop.f32.mrf.mxu1 }
 0x530   :  { %1738 = vrot.lane.b32.xlu0 %v1724_v57, %s2248_s13  ;;  %1744 = vrot.lane.b32.xlu1 %v1721_v56, %s2249_s14 }
 0x534   :  { %1746 = vrot.lane.b32.xlu0 %v1725_v60, %s2249_s14 }
 0x595   :  { %v1729_v0 = vpop.permute.xlu0 %1728 }
 0x596   :  { %v1750_v3 = vsel %vm408_vm3, %v1718_v2, %v1729_v0 }
 0x599   :  { %v1737_v62 = vpop.permute.xlu1 %1736 }
 0x59a   :  { %v1753_v5 = vsel %vm1752_vm4, %v1750_v3, %v1737_v62 }
 0x59e   :  { %v1731_v1 = vpop.permute.xlu1 %1730 }
 0x59f   :  { %v1751_v18 = vsel %vm408_vm3, %v1722_v8, %v1731_v1 }
 0x5a2   :  { %v1739_v6 = vpop.permute.xlu0 %1738  ;;  %v1745_v7 = vpop.permute.xlu1 %1744 }
 0x5a3   :  { %v1756_v17 = vsel %vm1755_vm5, %v1753_v5, %v1745_v7  ;;  %v1754_v19 = vsel %vm1752_vm4, %v1751_v18, %v1739_v6 }
 0x5a4   :  { %2044 = vmatprep.mubr.msk.f32.mxu0 %vm104_vm0, %v1756_v17 }
 0x5a6   :  { %v1747_v20 = vpop.permute.xlu0 %1746 }
 0x5a7   :  { %v1757_v23 = vsel %vm1755_vm5, %v1754_v19, %v1747_v20 }
 0x5a8   :  { %2045 = vmatmul.mubr.msk.f32.vlgmr.msra.gmra.mxu0 %vm104_vm0, %v1757_v23 }
 0x668   :  { %v2046_v25 = vpop.f32.mrf.mxu0 }
 0x669   :  { %v1847_v22 = vadd.f32 %v2046_v25, %v1898_v21 }
 0x66a   :  { %v1841_v24 = vpop.f32.mrf.mxu0 }
 0x66b   :  { %1851 = vst.msk [vmem:[#allocation11 + $0x8] sm:$0xff] %vm104_vm0, %v1847_v22  ;;  %v1842_v26 = vadd.f32 %v1898_v21, %v1841_v24 }
 0x66d   :  { %1850 = vst.msk [vmem:[#allocation11] sm:$0xff] %vm104_vm0, %v1842_v26 }
 0x66e   :  { %2212 = shalt.err (!%p2209_p1)
}
 0x66f   :  { %1863 = dma.vmem_to_hbm [thread:$0]  %s1858_s17, 256, %s2607_s7, [#allocation4], %s2232_s11, %s2232_s11, %s2233_s12  }
 0x670   :  { %2227 = dma.done.wait [#allocation4], 256  }
 0x671   :  { %2228 = vsyncadd [#allocation4], 4294967040 }
 0x672   :  { %1867 = vsyncpa [#allocation3], 1 }
 0x673   :  { %1868 = vsyncpa [#allocation6], 1 }
 0x674   :  { %1869 = vsyncpa [#allocation9], 1 }
 0x675   :  { %1870 = vsyncpa [#allocation4], 1 }

// kernel: tpu_custom_call.1
= control target key start
LH: loop header
LB: loop body
LE: loop exit
PB: predicated region body
PF: predicated region fallthrough
CT: control target
= control target key end

     0   :  { %12 = vsyncpa [#allocation3], 0  ;;  %s2600_s0 = inlined_call_operand.hbm [shape: f32[8,8], index: 0, kind: input, shape index: {}]   ;;  %s2601_s1 = inlined_call_operand.hbm [shape: f32[8,8], index: 1, kind: input, shape index: {}]   ;;  %s2602_s2 = inlined_call_operand.hbm [shape: f32[2,8,32], index: 2, kind: input, shape index: {}]   ;;  %s2603_s3 = inlined_call_operand.hbm [shape: f32[32,96], index: 3, kind: input, shape index: {}]   ;;  %s2604_s4 = inlined_call_operand.vmem [shape: f32[1,96], index: 4, kind: input, shape index: {}]   ;;  %s2605_s5 = inlined_call_operand.hbm [shape: f32[32,32], index: 5, kind: input, shape index: {}]   ;;  %s2606_s6 = inlined_call_operand.vmem [shape: f32[1,32], index: 6, kind: input, shape index: {}]   ;;  %s2607_s7 = inlined_call_operand.hbm [shape: f32[2,8,32], index: 7, kind: output, shape index: {}]  }
   0x1   :  { %13 = vsyncpa [#allocation6], 0 }
   0x2   :  { %14 = vsyncpa [#allocation9], 0 }
   0x3   :  { %15 = vsyncpa [#allocation4], 0  ;;  %s2229_s24 = smov [#allocation5]  }
   0x4   :  { %s32_s25 = sshll.u32 %s2229_s24, 4  ;;  %s33_s25 = int_to_ptr.vmem [resolvable:$true] %s32_s25 }
   0x5   :  { %s2109_s26 = scalar_lea.vmem %s33_s25, 128  ;;  %p2114_p1 = scmp.lt.s32.totalorder %s33_s25, %s33_s25 }
   0x6   :  { %p2110_p0 = scmp.ne.s32.totalorder %s33_s25, %s2109_s26  ;;  %p2115_p2 = scmp.lt.s32.totalorder %s2109_s26, %s2109_s26 }
   0x8   :  { %p2116_p3 = por %p2115_p2, %p2114_p1 }
   0xa   :  { %p2117_p4 = pnand %p2116_p3, %p2110_p0 }
   0xc   :  { %2120 = shalt.err (!%p2117_p4)
}
   0xd   :  { %35 = dma.hbm_to_vmem [thread:$0]  %s2601_s1, 128, %s33_s25, [#allocation6]  }
   0xe   :  { %s2230_s29 = smov [#allocation8]   ;;  %s2231_s8 = smov [#allocation2]  }
   0xf   :  { %s53_s30 = sshll.u32 %s2230_s29, 4  ;;  %s22_s9 = sshll.u32 %s2231_s8, 4  ;;  %s54_s30 = int_to_ptr.vmem [resolvable:$true] %s53_s30  ;;  %s23_s9 = int_to_ptr.vmem [resolvable:$true] %s22_s9 }
  0x10   :  { %s2129_s10 = scalar_lea.vmem %s54_s30, 512  ;;  %p2134_p6 = scmp.lt.s32.totalorder %s54_s30, %s54_s30 }
  0x11   :  { %p2130_p5 = scmp.ne.s32.totalorder %s54_s30, %s2129_s10  ;;  %p2135_p7 = scmp.lt.s32.totalorder %s2129_s10, %s2129_s10 }
  0x13   :  { %p2136_p8 = por %p2135_p7, %p2134_p6 }
  0x15   :  { %p2137_p9 = pnand %p2136_p8, %p2130_p5 }
  0x17   :  { %2140 = shalt.err (!%p2137_p9)
}
  0x18   :  { %s2232_s11 = smov 128   ;;  %s2233_s12 = smov 8  }
  0x19   :  { %59 = dma.hbm_to_vmem [thread:$0]  %s2603_s3, 512, %s54_s30, [#allocation9], %s2232_s11, %s2232_s11, %s2233_s12  }
  0x1a   :  { %s2149_s1 = scalar_lea.vmem %s23_s9, 128  ;;  %p2154_p11 = scmp.lt.s32.totalorder %s23_s9, %s23_s9 }
  0x1b   :  { %p2150_p10 = scmp.ne.s32.totalorder %s23_s9, %s2149_s1  ;;  %p2155_p12 = scmp.lt.s32.totalorder %s2149_s1, %s2149_s1 }
  0x1d   :  { %p2156_p13 = por %p2155_p12, %p2154_p11 }
  0x1f   :  { %p2157_p0 = pnand %p2156_p13, %p2150_p10 }
  0x21   :  { %2160 = shalt.err (!%p2157_p0)
}
  0x22   :  { %25 = dma.hbm_to_vmem [thread:$0]  %s2600_s0, 128, %s23_s9, [#allocation3]  }
  0x23   :  { %s2234_s17 = smov [#allocation7]   ;;  %s2235_s19 = smov [#allocation10]  }
  0x24   :  { %s41_s18 = sshll.u32 %s2234_s17, 4  ;;  %s67_s20 = sshll.u32 %s2235_s19, 4  ;;  %s42_s18 = int_to_ptr.vmem [resolvable:$true] %s41_s18  ;;  %s68_s20 = int_to_ptr.vmem [resolvable:$true] %s67_s20 }
  0x25   :  { %s2169_s21 = scalar_lea.vmem %s42_s18, 256  ;;  %p2174_p2 = scmp.lt.s32.totalorder %s42_s18, %s42_s18 }
  0x26   :  { %p2170_p1 = scmp.ne.s32.totalorder %s42_s18, %s2169_s21  ;;  %p2175_p3 = scmp.lt.s32.totalorder %s2169_s21, %s2169_s21 }
  0x28   :  { %p2176_p4 = por %p2175_p3, %p2174_p2 }
  0x2a   :  { %p2177_p5 = pnand %p2176_p4, %p2170_p1 }
  0x2c   :  { %2180 = shalt.err (!%p2177_p5)
}
  0x2d   :  { %47 = dma.hbm_to_vmem [thread:$0]  %s2602_s2, 256, %s42_s18, [#allocation6], %s2232_s11, %s2232_s11, %s2233_s12  }
  0x2e   :  { %s2189_s0 = scalar_lea.vmem %s68_s20, 512  ;;  %p2194_p7 = scmp.lt.s32.totalorder %s68_s20, %s68_s20 }
  0x2f   :  { %p2190_p6 = scmp.ne.s32.totalorder %s68_s20, %s2189_s0  ;;  %p2195_p8 = scmp.lt.s32.totalorder %s2189_s0, %s2189_s0 }
  0x31   :  { %p2196_p9 = por %p2195_p8, %p2194_p7 }
  0x33   :  { %p2197_p10 = pnand %p2196_p9, %p2190_p6 }
  0x35   :  { %2200 = shalt.err (!%p2197_p10)
}
  0x36   :  { %73 = dma.hbm_to_vmem [thread:$0]  %s2605_s5, 512, %s68_s20, [#allocation9], %s2232_s11, %s2232_s11, %s2233_s12  }
  0x37   :  { %2221 = dma.done.wait [#allocation3], 128  }
  0x38   :  { %2222 = vsyncadd [#allocation3], 4294967168 }
  0x39   :  { %2223 = dma.done.wait [#allocation6], 384  }
  0x3a   :  { %2224 = vsyncadd [#allocation6], 4294966912 }
  0x3b   :  { %2225 = dma.done.wait [#allocation9], 1024  }
  0x3c   :  { %2226 = vsyncadd [#allocation9], 4294966272  ;;  %vm104_vm0 = vcmask 261120   ;;  %v96_v0 = vld [vmem:[#allocation8 + $0x18] sm:$0xff]  ;;  %v95_v1 = vld [vmem:[#allocation8 + $0x10] sm:$0xff]  ;;  %s2236_s25 = smov 104  }
  0x3d   :  { %1945 = vmatprep.subr.mxu0 %v96_v0  ;;  %v91_v2 = vld [vmem:[#allocation7] sm:$0xff]  ;;  %v94_v3 = vld [vmem:[#allocation8 + $0x8] sm:$0xff]  ;;  %v93_v4 = vld [vmem:[#allocation8] sm:$0xff]  ;;  %s2237_s26 = smov 120   ;;  %s2238_s27 = smov 112   ;;  %vm264_vm1 = vcmask 31744  }
  0x3e   :  { %1946 = vmatpush3.msra.mxu0 %v96_v0  ;;  %1953 = vmatprep.mubr.msk.f32.mxu0 %vm104_vm0, %v91_v2  ;;  %v92_v5 = vld [vmem:[#allocation7 + $0x8] sm:$0xff]  ;;  %v1871_v7 = vld [vmem:[%s2604_s4] ss:$0 sm:$0xff]  ;;  %s2239_s4 = smov 100   ;;  %s2240_s28 = smov 92   ;;  %v2363_v25 = vld [vmem:[#allocation5] sm:$0xff] }
  0x3f   :  { %1947 = vmatprep.subr.mxu0 %v95_v1  ;;  %v2360_v23 = vld [vmem:[#allocation2] sm:$0xff]  ;;  %s2241_s29 = smov 32   ;;  %s2242_s30 = smov 124   ;;  %v2244_v51 = vmov 0.0   ;;  %vm2245_vm2 = vmmov 0   ;;  %vm408_vm3 = vcmask 64512  }
  0x40   :  { %1948 = vmatpush3.msra.mxu0 %v95_v1  ;;  %s2243_s8 = smov 4   ;;  %1956 = vmatprep.subr.mxu1 %v2244_v51  ;;  %s2246_s9 = smov 96   ;;  %vm1752_vm4 = vcmask 130048   ;;  %vm1755_vm5 = vcmask 195584  }
  0x41   :  { %1949 = vmatprep.subr.mxu0 %v94_v3  ;;  %1958 = vmatprep.mubr.msk.f32.mxu1 %vm2245_vm2, %v2244_v51  ;;  %s2247_s10 = smov 64   ;;  %s2248_s13 = smov 16  }
  0x42   :  { %1950 = vmatpush3.msra.mxu0 %v94_v3  ;;  %s2249_s14 = smov 24   ;;  %s2250_s16 = smov [#allocation11]  }
  0x43   :  { %1951 = vmatprep.subr.mxu0 %v93_v4  ;;  %s1857_s17 = sshll.u32 %s2250_s16, 4  ;;  %s1858_s17 = int_to_ptr.vmem [resolvable:$true] %s1857_s17 }
  0x44   :  { %1952 = vmatpush3.msra.mxu0 %v93_v4  ;;  %s2201_s18 = scalar_lea.vmem %s1858_s17, 256  ;;  %p2206_p12 = scmp.lt.s32.totalorder %s1858_s17, %s1858_s17 }
  0x45   :  { %1954 = vmatmul.mubr.msk.f32.vlgmr.msra.gmra.mxu0 %vm104_vm0, %v92_v5  ;;  %1976 = vmatprep.subr.mxu0 %v2244_v51  ;;  %p2202_p11 = scmp.ne.s32.totalorder %s1858_s17, %s2201_s18  ;;  %p2207_p13 = scmp.lt.s32.totalorder %s2201_s18, %s2201_s18 }
  0x46   :  { %1978 = vmatprep.mubr.msk.f32.mxu0 %vm2245_vm2, %v2244_v51 }
  0x47   :  { %p2208_p0 = por %p2207_p13, %p2206_p12 }
  0x49   :  { %p2209_p1 = pnand %p2208_p0, %p2202_p11 }
 0x105   :  { %v1955_v6 = vpop.f32.mrf.mxu0 }
 0x106   :  { %v2324_v10 = vadd.f32 %v1955_v6, %v1871_v7 }
 0x107   :  { %v177_v8 = vpop.f32.mrf.mxu0 }
 0x108   :  { %v2320_v9 = vadd.f32 %v1871_v7, %v177_v8 }
 0x10a   :  { %200 = vrot.lane.b32.xlu1 %v2320_v9, %s2236_s25  ;;  %188 = vrot.lane.b32.xlu0 %v2320_v9, %s2237_s26 }
 0x10e   :  { %190 = vrot.lane.b32.xlu1 %v2324_v10, %s2237_s26  ;;  %194 = vrot.lane.b32.xlu0 %v2320_v9, %s2238_s27 }
 0x112   :  { %202 = vrot.lane.b32.xlu1 %v2324_v10, %s2236_s25  ;;  %196 = vrot.lane.b32.xlu0 %v2324_v10, %s2238_s27 }
 0x116   :  { %333 = vrot.lane.b32.xlu1 %v2324_v10, %s2239_s4  ;;  %309 = vrot.lane.b32.xlu0 %v2324_v10, %s2240_s28 }
 0x11a   :  { %325 = vrot.lane.b32.xlu1 %v2320_v9, %s2239_s4  ;;  %301 = vrot.lane.b32.xlu0 %v2320_v9, %s2240_s28 }
 0x17c   :  { %v2334_v11 = vpop.permute.xlu1 %200  ;;  %v2336_v12 = vpop.permute.xlu0 %188 }
 0x180   :  { %v2338_v13 = vpop.permute.xlu1 %190  ;;  %v2340_v14 = vpop.permute.xlu0 %194 }
 0x181   :  { %335 = vrot.lane.b32.xlu1 %v2338_v13, %s2239_s4  ;;  %311 = vrot.lane.b32.xlu0 %v2338_v13, %s2240_s28 }
 0x184   :  { %v2344_v15 = vpop.permute.xlu1 %202  ;;  %v2346_v16 = vpop.permute.xlu0 %196 }
 0x185   :  { %327 = vrot.lane.b32.xlu1 %v2336_v12, %s2239_s4  ;;  %303 = vrot.lane.b32.xlu0 %v2336_v12, %s2240_s28 }
 0x188   :  { %v334_v17 = vpop.permute.xlu1 %333  ;;  %v310_v18 = vpop.permute.xlu0 %309 }
 0x189   :  { %v353_v19 = vsel %vm264_vm1, %v310_v18, %v334_v17  ;;  %329 = vrot.lane.b32.xlu1 %v2340_v14, %s2239_s4  ;;  %305 = vrot.lane.b32.xlu0 %v2340_v14, %s2240_s28 }
 0x18a   :  { %v361_v39 = vmul.f32 %v353_v19, %v2360_v23 }
 0x18c   :  { %v326_v20 = vpop.permute.xlu1 %325  ;;  %v302_v21 = vpop.permute.xlu0 %301 }
 0x18d   :  { %331 = vrot.lane.b32.xlu1 %v2334_v11, %s2239_s4  ;;  %307 = vrot.lane.b32.xlu0 %v2334_v11, %s2240_s28  ;;  %v349_v22 = vsel %vm264_vm1, %v302_v21, %v326_v20 }
 0x18e   :  { %v357_v24 = vmul.f32 %v349_v22, %v2360_v23 }
 0x191   :  { %337 = vrot.lane.b32.xlu1 %v2346_v16, %s2239_s4  ;;  %313 = vrot.lane.b32.xlu0 %v2346_v16, %s2240_s28 }
 0x195   :  { %339 = vrot.lane.b32.xlu1 %v2344_v15, %s2239_s4  ;;  %315 = vrot.lane.b32.xlu0 %v2344_v15, %s2240_s28 }
 0x199   :  { %290 = vrot.lane.b32.xlu0 %v2363_v25, %s2241_s29  ;;  %373 = vrot.lane.b32.xlu1 %v357_v24, %s2241_s29 }
 0x1f3   :  { %v336_v26 = vpop.permute.xlu1 %335  ;;  %v312_v27 = vpop.permute.xlu0 %311 }
 0x1f4   :  { %v354_v41 = vsel %vm264_vm1, %v312_v27, %v336_v26 }
 0x1f5   :  { %v362_v45 = vmul.f32 %v354_v41, %v2360_v23 }
 0x1f7   :  { %v328_v28 = vpop.permute.xlu1 %327  ;;  %v304_v29 = vpop.permute.xlu0 %303 }
 0x1f8   :  { %v350_v30 = vsel %vm264_vm1, %v304_v29, %v328_v28 }
 0x1f9   :  { %v358_v31 = vmul.f32 %v350_v30, %v2360_v23 }
 0x1fb   :  { %v330_v32 = vpop.permute.xlu1 %329  ;;  %375 = vrot.lane.b32.xlu0 %v358_v31, %s2241_s29  ;;  %v306_v33 = vpop.permute.xlu0 %305 }
 0x1fc   :  { %v351_v34 = vsel %vm264_vm1, %v306_v33, %v330_v32  ;;  %v208_v32 = vmul.f32 %v2363_v25, %v2320_v9 }
 0x1fd   :  { %v359_v35 = vmul.f32 %v351_v34, %v2360_v23 }
 0x1ff   :  { %v332_v36 = vpop.permute.xlu1 %331  ;;  %377 = vrot.lane.b32.xlu1 %v359_v35, %s2241_s29  ;;  %v308_v37 = vpop.permute.xlu0 %307 }
 0x200   :  { %v352_v38 = vsel %vm264_vm1, %v308_v37, %v332_v36 }
 0x201   :  { %v360_v40 = vmul.f32 %v352_v38, %v2360_v23 }
 0x203   :  { %v338_v42 = vpop.permute.xlu1 %337  ;;  %381 = vrot.lane.b32.xlu1 %v361_v39, %s2241_s29  ;;  %379 = vrot.lane.b32.xlu0 %v360_v40, %s2241_s29  ;;  %v314_v43 = vpop.permute.xlu0 %313 }
 0x204   :  { %v355_v44 = vsel %vm264_vm1, %v314_v43, %v338_v42 }
 0x205   :  { %v363_v46 = vmul.f32 %v355_v44, %v2360_v23 }
 0x207   :  { %v340_v47 = vpop.permute.xlu1 %339  ;;  %383 = vrot.lane.b32.xlu0 %v362_v45, %s2241_s29  ;;  %385 = vrot.lane.b32.xlu1 %v363_v46, %s2241_s29  ;;  %v316_v48 = vpop.permute.xlu0 %315 }
 0x208   :  { %v356_v49 = vsel %vm264_vm1, %v316_v48, %v340_v47 }
 0x209   :  { %v364_v50 = vmul.f32 %v356_v49, %v2360_v23  ;;  %v209_v49 = vmul.f32 %v2363_v25, %v2336_v12 }
 0x20b   :  { %216 = vrot.lane.b32.xlu1 %v2320_v9, %s2242_s30  ;;  %387 = vrot.lane.b32.xlu0 %v364_v50, %s2241_s29  ;;  %v291_v52 = vpop.permute.xlu0 %290  ;;  %v374_v54 = vpop.permute.xlu1 %373 }
 0x20c   :  { %v293_v53 = vmul.f32 %v291_v52, %v2320_v9  ;;  %v297_v58 = vmul.f32 %v291_v52, %v2324_v10  ;;  %v295_v62 = vmul.f32 %v291_v52, %v2340_v14  ;;  %v298_v63 = vmul.f32 %v291_v52, %v2338_v13 }
 0x20d   :  { %v294_v4 = vmul.f32 %v291_v52, %v2336_v12  ;;  %v296_v8 = vmul.f32 %v291_v52, %v2334_v11  ;;  %v299_v17 = vmul.f32 %v291_v52, %v2346_v16  ;;  %v300_v24 = vmul.f32 %v291_v52, %v2344_v15 }
 0x20e   :  { %v397_v55 = vadd.f32 %v374_v54, %v293_v53 }
 0x20f   :  { %242 = vrot.lane.b32.xlu1 %v2336_v12, %s2243_s8  ;;  %240 = vrot.lane.b32.xlu0 %v2320_v9, %s2243_s8 }
 0x213   :  { %220 = vrot.lane.b32.xlu1 %v2340_v14, %s2242_s30  ;;  %218 = vrot.lane.b32.xlu0 %v2336_v12, %s2242_s30 }
 0x217   :  { %246 = vrot.lane.b32.xlu1 %v2334_v11, %s2243_s8  ;;  %244 = vrot.lane.b32.xlu0 %v2340_v14, %s2243_s8 }
 0x21b   :  { %224 = vrot.lane.b32.xlu1 %v2324_v10, %s2242_s30  ;;  %222 = vrot.lane.b32.xlu0 %v2334_v11, %s2242_s30 }
 0x21f   :  { %226 = vrot.lane.b32.xlu1 %v2338_v13, %s2242_s30  ;;  %248 = vrot.lane.b32.xlu0 %v2324_v10, %s2243_s8 }
 0x223   :  { %250 = vrot.lane.b32.xlu0 %v2338_v13, %s2243_s8  ;;  %406 = vrot.lane.b32.xlu1 %v397_v55, %s2246_s9 }
 0x26d   :  { %v376_v56 = vpop.permute.xlu0 %375 }
 0x26e   :  { %v398_v6 = vadd.f32 %v376_v56, %v294_v4  ;;  %v210_v56 = vmul.f32 %v2363_v25, %v2340_v14 }
 0x271   :  { %v378_v57 = vpop.permute.xlu1 %377 }
 0x272   :  { %v399_v2 = vadd.f32 %v378_v57, %v295_v62  ;;  %v211_v62 = vmul.f32 %v2363_v25, %v2334_v11 }
 0x275   :  { %v382_v59 = vpop.permute.xlu1 %381  ;;  %v380_v60 = vpop.permute.xlu0 %379 }
 0x276   :  { %v401_v61 = vadd.f32 %v382_v59, %v297_v58  ;;  %v400_v19 = vadd.f32 %v380_v60, %v296_v8 }
 0x278   :  { %719 = vrot.lane.b32.xlu1 %v401_v61, %s2246_s9 }
 0x279   :  { %v386_v0 = vpop.permute.xlu1 %385  ;;  %v384_v1 = vpop.permute.xlu0 %383 }
 0x27a   :  { %v402_v3 = vadd.f32 %v384_v1, %v298_v63  ;;  %v403_v20 = vadd.f32 %v386_v0, %v299_v17  ;;  %v214_v63 = vmul.f32 %v2363_v25, %v2346_v16 }
 0x27c   :  { %563 = vrot.lane.b32.xlu1 %v399_v2, %s2246_s9  ;;  %797 = vrot.lane.b32.xlu0 %v402_v3, %s2246_s9 }
 0x27d   :  { %v217_v5 = vpop.permute.xlu1 %216  ;;  %v388_v21 = vpop.permute.xlu0 %387 }
 0x27e   :  { %v404_v28 = vadd.f32 %v388_v21, %v300_v24 }
 0x280   :  { %228 = vrot.lane.b32.xlu1 %v2346_v16, %s2242_s30  ;;  %485 = vrot.lane.b32.xlu0 %v398_v6, %s2246_s9 }
 0x281   :  { %v243_v7 = vpop.permute.xlu1 %242  ;;  %v241_v26 = vpop.permute.xlu0 %240 }
 0x282   :  { %v265_v29 = vsel %vm264_vm1, %v217_v5, %v241_v26  ;;  %v213_v5 = vmul.f32 %v2363_v25, %v2338_v13 }
 0x283   :  { %v273_v31 = vmul.f32 %v265_v29, %v2360_v23 }
 0x284   :  { %230 = vrot.lane.b32.xlu1 %v2344_v15, %s2242_s30  ;;  %252 = vrot.lane.b32.xlu0 %v2346_v16, %s2243_s8 }
 0x285   :  { %v221_v18 = vpop.permute.xlu1 %220  ;;  %v281_v34 = vadd.f32 %v273_v31, %v208_v32  ;;  %v219_v35 = vpop.permute.xlu0 %218 }
 0x286   :  { %v266_v44 = vsel %vm264_vm1, %v219_v35, %v243_v7 }
 0x287   :  { %v274_v47 = vmul.f32 %v266_v44, %v2360_v23 }
 0x288   :  { %875 = vrot.lane.b32.xlu1 %v403_v20, %s2246_s9  ;;  %641 = vrot.lane.b32.xlu0 %v400_v19, %s2246_s9 }
 0x289   :  { %v247_v22 = vpop.permute.xlu1 %246  ;;  %v245_v36 = vpop.permute.xlu0 %244  ;;  %v282_v53 = vadd.f32 %v274_v47, %v209_v49 }
 0x28a   :  { %v267_v48 = vsel %vm264_vm1, %v221_v18, %v245_v36  ;;  %v215_v18 = vmul.f32 %v2363_v25, %v2344_v15 }
 0x28b   :  { %v275_v54 = vmul.f32 %v267_v48, %v2360_v23 }
 0x28c   :  { %1178 = vrot.lane.b32.xlu1 %v2336_v12, %s2247_s10  ;;  %254 = vrot.lane.b32.xlu0 %v2344_v15, %s2243_s8 }
 0x28d   :  { %v225_v27 = vpop.permute.xlu1 %224  ;;  %v223_v37 = vpop.permute.xlu0 %222  ;;  %v283_v59 = vadd.f32 %v275_v54, %v210_v56 }
 0x28e   :  { %v268_v55 = vsel %vm264_vm1, %v223_v37, %v247_v22 }
 0x28f   :  { %v276_v60 = vmul.f32 %v268_v55, %v2360_v23 }
 0x290   :  { %1254 = vrot.lane.b32.xlu1 %v2340_v14, %s2247_s10  ;;  %953 = vrot.lane.b32.xlu0 %v404_v28, %s2246_s9 }
 0x291   :  { %v227_v30 = vpop.permute.xlu1 %226  ;;  %v249_v38 = vpop.permute.xlu0 %248  ;;  %v284_v2 = vadd.f32 %v276_v60, %v211_v62 }
 0x292   :  { %v269_v39 = vsel %vm264_vm1, %v225_v27, %v249_v38 }
 0x293   :  { %v277_v40 = vmul.f32 %v269_v39, %v2360_v23 }
 0x294   :  { %1102 = vrot.lane.b32.xlu0 %v2320_v9, %s2247_s10  ;;  %v212_v9 = vmul.f32 %v2363_v25, %v2324_v10 }
 0x295   :  { %v407_v33 = vpop.permute.xlu1 %406  ;;  %v251_v41 = vpop.permute.xlu0 %250 }
 0x296   :  { %1957 = vmatpush3.xpose.msk.msra.mxu1 %vm408_vm3, %v407_v33  ;;  %v285_v43 = vadd.f32 %v277_v40, %v212_v9  ;;  %v270_v14 = vsel %vm264_vm1, %v227_v30, %v251_v41 }
 0x297   :  { %1961 = vmatprep.subr.mxu1 %v2244_v51  ;;  %v278_v3 = vmul.f32 %v270_v14, %v2360_v23 }
 0x299   :  { %1959 = vmatmul.mubr.msk.f32.vlgmr.msra.gmra.mxu1 %vm408_vm3, %v281_v34  ;;  %v286_v8 = vadd.f32 %v278_v3, %v213_v5 }
 0x29a   :  { %1963 = vmatprep.mubr.msk.f32.mxu1 %vm2245_vm2, %v2244_v51 }
 0x2ea   :  { %v720_v42 = vpop.permute.xlu1 %719 }
 0x2eb   :  { %1977 = vmatpush3.xpose.msk.msra.mxu0 %vm408_vm3, %v720_v42 }
 0x2ec   :  { %1986 = vmatprep.subr.mxu0 %v2244_v51 }
 0x2ee   :  { %v564_v45 = vpop.permute.xlu1 %563  ;;  %1979 = vmatmul.mubr.msk.f32.vlgmr.msra.gmra.mxu0 %vm408_vm3, %v285_v43  ;;  %v798_v46 = vpop.permute.xlu0 %797 }
 0x2ef   :  { %1988 = vmatprep.mubr.msk.f32.mxu0 %vm2245_vm2, %v2244_v51 }
 0x2f2   :  { %v229_v50 = vpop.permute.xlu1 %228  ;;  %v486_v52 = vpop.permute.xlu0 %485 }
 0x2f3   :  { %1962 = vmatpush3.xpose.msk.msra.mxu1 %vm408_vm3, %v486_v52 }
 0x2f4   :  { %1966 = vmatprep.subr.mxu1 %v2244_v51 }
 0x2f6   :  { %v231_v57 = vpop.permute.xlu1 %230  ;;  %v253_v58 = vpop.permute.xlu0 %252  ;;  %1964 = vmatmul.mubr.msk.f32.vlgmr.msra.gmra.mxu1 %vm408_vm3, %v282_v53 }
 0x2f7   :  { %v271_v12 = vsel %vm264_vm1, %v229_v50, %v253_v58  ;;  %1967 = vmatpush3.xpose.msk.msra.mxu1 %vm408_vm3, %v564_v45  ;;  %1968 = vmatprep.mubr.msk.f32.mxu1 %vm2245_vm2, %v2244_v51 }
 0x2f8   :  { %v279_v61 = vmul.f32 %v271_v12, %v2360_v23  ;;  %1971 = vmatprep.subr.mxu1 %v2244_v51 }
 0x2fa   :  { %v876_v0 = vpop.permute.xlu1 %875  ;;  %v642_v1 = vpop.permute.xlu0 %641  ;;  %1969 = vmatmul.mubr.msk.f32.vlgmr.msra.gmra.mxu1 %vm408_vm3, %v283_v59  ;;  %v287_v4 = vadd.f32 %v279_v61, %v214_v63 }
 0x2fb   :  { %1972 = vmatpush3.xpose.msk.msra.mxu1 %vm408_vm3, %v642_v1  ;;  %1987 = vmatpush3.xpose.msk.msra.mxu0 %vm408_vm3, %v876_v0 }
 0x2fc   :  { %1973 = vmatprep.mubr.msk.f32.mxu1 %vm2245_vm2, %v2244_v51  ;;  %1981 = vmatprep.subr.mxu1 %v2244_v51 }
 0x2fd   :  { %1996 = vmatprep.subr.mxu0 %v2244_v51 }
 0x2fe   :  { %1989 = vmatmul.mubr.msk.f32.vlgmr.msra.gmra.mxu0 %vm408_vm3, %v287_v4  ;;  %v255_v6 = vpop.permute.xlu0 %254  ;;  %1974 = vmatmul.mubr.msk.f32.vlgmr.msra.gmra.mxu1 %vm408_vm3, %v284_v2 }
 0x2ff   :  { %v272_v7 = vsel %vm264_vm1, %v231_v57, %v255_v6  ;;  %1982 = vmatpush3.xpose.msk.msra.mxu1 %vm408_vm3, %v798_v46  ;;  %1983 = vmatprep.mubr.msk.f32.mxu1 %vm2245_vm2, %v2244_v51 }
 0x300   :  { %v280_v17 = vmul.f32 %v272_v7, %v2360_v23  ;;  %1991 = vmatprep.subr.mxu1 %v2244_v51  ;;  %1998 = vmatprep.mubr.msk.f32.mxu0 %vm2245_vm2, %v2244_v51  ;;  %v1179_v23 = vpop.permute.xlu1 %1178 }
 0x302   :  { %v954_v19 = vpop.permute.xlu0 %953  ;;  %1984 = vmatmul.mubr.msk.f32.vlgmr.msra.gmra.mxu1 %vm408_vm3, %v286_v8  ;;  %v288_v20 = vadd.f32 %v280_v17, %v215_v18 }
 0x303   :  { %1992 = vmatpush3.xpose.msk.msra.mxu1 %vm408_vm3, %v954_v19  ;;  %1993 = vmatprep.mubr.msk.f32.mxu1 %vm2245_vm2, %v2244_v51 }
 0x304   :  { %2001 = vmatprep.subr.mxu1 %v2244_v51  ;;  %v1255_v45 = vpop.permute.xlu1 %1254 }
 0x306   :  { %v1103_v21 = vpop.permute.xlu0 %1102  ;;  %1994 = vmatmul.mubr.msk.f32.vlgmr.msra.gmra.mxu1 %vm408_vm3, %v288_v20 }
 0x307   :  { %1997 = vmatpush3.msra.mxu0 %v1103_v21  ;;  %2002 = vmatpush3.msra.mxu1 %v1179_v23 }
 0x308   :  { %2006 = vmatprep.subr.mxu0 %v2244_v51  ;;  %2003 = vmatprep.mubr.msk.f32.mxu1 %vm2245_vm2, %v2244_v51 }
 0x309   :  { %2011 = vmatprep.subr.mxu1 %v2244_v51 }
 0x359   :  { %v480_v25 = vpop.f32.mrf.mxu1 }
 0x35a   :  { %v1030_v22 = vsel %vm408_vm3, %v480_v25, -inf }
 0x35b   :  { %1031 = vmax.xlane.f32.xlu1 %v1030_v22  ;;  %v1960_v24 = vpop.f32.mrf.mxu1 }
 0x36c   :  { %1406 = vrot.lane.b32.xlu1 %v2324_v10, %s2247_s10 }
 0x3ae   :  { %v2525_v26 = vpop.f32.mrf.mxu0 }
 0x3af   :  { %v1042_v27 = vsel %vm408_vm3, %v2525_v26, -inf }
 0x3b0   :  { %1043 = vmax.xlane.f32.xlu0 %v1042_v27  ;;  %v1980_v28 = vpop.f32.mrf.mxu0 }
 0x3b6   :  { %v558_v29 = vpop.f32.mrf.mxu1 }
 0x3b7   :  { %v1033_v39 = vsel %vm408_vm3, %v558_v29, -inf }
 0x3b8   :  { %v1965_v30 = vpop.f32.mrf.mxu1 }
 0x3ba   :  { %v636_v31 = vpop.f32.mrf.mxu1 }
 0x3bb   :  { %v1036_v42 = vsel %vm408_vm3, %v636_v31, -inf }
 0x3bc   :  { %v1970_v32 = vpop.f32.mrf.mxu1 }
 0x3be   :  { %v714_v33 = vpop.f32.mrf.mxu1  ;;  %v948_v34 = vpop.f32.mrf.mxu0 }
 0x3bf   :  { %v1048_v35 = vsel %vm408_vm3, %v948_v34, -inf  ;;  %v1039_v36 = vsel %vm408_vm3, %v714_v33, -inf }
 0x3c0   :  { %1049 = vmax.xlane.f32.xlu0 %v1048_v35  ;;  %v1990_v37 = vpop.f32.mrf.mxu0  ;;  %1040 = vmax.xlane.f32.xlu1 %v1039_v36  ;;  %v1975_v10 = vpop.f32.mrf.mxu1  ;;  %v1761_v36 = vld [vmem:[#allocation10 + $0x18] sm:$0xff] }
 0x3c1   :  { %v1760_v37 = vld [vmem:[#allocation10 + $0x10] sm:$0xff] }
 0x3c2   :  { %v870_v38 = vpop.f32.mrf.mxu1 }
 0x3c3   :  { %v1045_v40 = vsel %vm408_vm3, %v870_v38, -inf }
 0x3c4   :  { %1034 = vmax.xlane.f32.xlu0 %v1033_v39  ;;  %1046 = vmax.xlane.f32.xlu1 %v1045_v40  ;;  %v1985_v9 = vpop.f32.mrf.mxu1 }
 0x3c6   :  { %v1026_v41 = vpop.f32.mrf.mxu1 }
 0x3c7   :  { %v1051_v43 = vsel %vm408_vm3, %v1026_v41, -inf }
 0x3c8   :  { %1037 = vmax.xlane.f32.xlu0 %v1036_v42  ;;  %1052 = vmax.xlane.f32.xlu1 %v1051_v43  ;;  %v1995_v44 = vpop.f32.mrf.mxu1 }
 0x3d9   :  { %1558 = vrot.lane.b32.xlu1 %v2346_v16, %s2247_s10 }
 0x3de   :  { %1330 = vrot.lane.b32.xlu0 %v2334_v11, %s2247_s10 }
 0x3e2   :  { %1482 = vrot.lane.b32.xlu0 %v2338_v13, %s2247_s10 }
 0x3e4   :  { %v1032_v46 = vpop.xlane.xlu1 %1031 }
 0x3e5   :  { %v1054_v47 = vsub.f32 %v480_v25, %v1032_v46 }
 0x3e6   :  { %1634 = vrot.lane.b32.xlu0 %v2344_v15, %s2247_s10 }
 0x3e7   :  { %v1062_v48 = vmul.f32 1.442695, %v1054_v47 }
 0x3e8   :  { %v1407_v11 = vpop.permute.xlu1 %1406 }
 0x3e9   :  { %2069 = vpow2.f32 %v1062_v48 }
 0x3f6   :  { %v2543_v49 = vpop.eup %2069 }
 0x3f7   :  { %1999 = vmatmul.mubr.msk.f32.vlgmr.msra.gmra.mxu0 %vm408_vm3, %v2543_v49 }
 0x3f8   :  { %2007 = vmatpush3.msra.mxu0 %v1255_v45  ;;  %2008 = vmatprep.mubr.msk.f32.mxu0 %vm2245_vm2, %v2244_v51  ;;  %v1758_v45 = vld [vmem:[#allocation10] sm:$0xff] }
 0x3f9   :  { %2016 = vmatprep.subr.mxu0 %v2244_v51 }
 0x439   :  { %v1044_v13 = vpop.xlane.xlu0 %1043 }
 0x43a   :  { %v1058_v61 = vsub.f32 %v2525_v26, %v1044_v13 }
 0x43c   :  { %v1070_v1 = vmul.f32 1.442695, %v1058_v61 }
 0x449   :  { %v1050_v16 = vpop.xlane.xlu0 %1049  ;;  %v1041_v50 = vpop.xlane.xlu1 %1040 }
 0x44a   :  { %v1057_v52 = vsub.f32 %v714_v33, %v1041_v50  ;;  %v1060_v63 = vsub.f32 %v948_v34, %v1050_v16 }
 0x44c   :  { %v1068_v56 = vmul.f32 1.442695, %v1057_v52  ;;  %v1074_v2 = vmul.f32 1.442695, %v1060_v63 }
 0x44d   :  { %v1035_v53 = vpop.xlane.xlu0 %1034  ;;  %v1047_v15 = vpop.xlane.xlu1 %1046 }
 0x44e   :  { %v1055_v54 = vsub.f32 %v558_v29, %v1035_v53  ;;  %v1059_v57 = vsub.f32 %v870_v38, %v1047_v15  ;;  %v1078_v29 = vsel %vm408_vm3, %v2543_v49, 0.0 }
 0x450   :  { %v1064_v55 = vmul.f32 1.442695, %v1055_v54  ;;  %v1072_v62 = vmul.f32 1.442695, %v1059_v57 }
 0x451   :  { %v1038_v58 = vpop.xlane.xlu0 %1037  ;;  %v1053_v12 = vpop.xlane.xlu1 %1052 }
 0x452   :  { %2071 = vpow2.f32 %v1064_v55  ;;  %v1056_v59 = vsub.f32 %v636_v31, %v1038_v58  ;;  %v1061_v60 = vsub.f32 %v1026_v41, %v1053_v12  ;;  %v1759_v41 = vld [vmem:[#allocation10 + $0x8] sm:$0xff] }
 0x453   :  { %2073 = vpow2.f32 %v1068_v56 }
 0x454   :  { %v1066_v14 = vmul.f32 1.442695, %v1056_v59  ;;  %v1076_v0 = vmul.f32 1.442695, %v1061_v60 }
 0x455   :  { %v1331_v3 = vpop.permute.xlu0 %1330  ;;  %v1559_v21 = vpop.permute.xlu1 %1558 }
 0x456   :  { %2075 = vpow2.f32 %v1066_v14 }
 0x457   :  { %2077 = vpow2.f32 %v1072_v62 }
 0x458   :  { %2079 = vpow2.f32 %v1076_v0 }
 0x459   :  { %2081 = vpow2.f32 %v1070_v1  ;;  %v1483_v8 = vpop.permute.xlu0 %1482 }
 0x45a   :  { %2083 = vpow2.f32 %v1074_v2 }
 0x45d   :  { %v1635_v25 = vpop.permute.xlu0 %1634 }
 0x45f   :  { %v2072_v4 = vpop.eup %2071 }
 0x460   :  { %2004 = vmatmul.mubr.msk.f32.vlgmr.msra.gmra.mxu1 %vm408_vm3, %v2072_v4  ;;  %v1081_v5 = vsel %vm408_vm3, %v2072_v4, 0.0  ;;  %v2074_v6 = vpop.eup %2073 }
 0x461   :  { %2012 = vmatpush3.msra.mxu1 %v1331_v3  ;;  %1082 = vadd.xlane.f32.xlu1 %v1081_v5  ;;  %v1087_v18 = vsel %vm408_vm3, %v2074_v6, 0.0 }
 0x462   :  { %2013 = vmatprep.mubr.msk.f32.mxu1 %vm2245_vm2, %v2244_v51  ;;  %2021 = vmatprep.subr.mxu1 %v2244_v51 }
 0x463   :  { %v2076_v7 = vpop.eup %2075 }
 0x464   :  { %2009 = vmatmul.mubr.msk.f32.vlgmr.msra.gmra.mxu0 %vm408_vm3, %v2076_v7  ;;  %2014 = vmatmul.mubr.msk.f32.vlgmr.msra.gmra.mxu1 %vm408_vm3, %v2074_v6  ;;  %v1084_v17 = vsel %vm408_vm3, %v2076_v7, 0.0  ;;  %v2078_v19 = vpop.eup %2077 }
 0x465   :  { %2017 = vmatpush3.msra.mxu0 %v1407_v11  ;;  %2022 = vmatpush3.msra.mxu1 %v1483_v8  ;;  %v2080_v20 = vpop.eup %2079  ;;  %v1093_v22 = vsel %vm408_vm3, %v2078_v19, 0.0 }
 0x466   :  { %1085 = vadd.xlane.f32.xlu0 %v1084_v17  ;;  %1088 = vadd.xlane.f32.xlu1 %v1087_v18  ;;  %v2082_v23 = vpop.eup %2081  ;;  %v1099_v24 = vsel %vm408_vm3, %v2080_v20, 0.0 }
 0x467   :  { %2018 = vmatprep.mubr.msk.f32.mxu0 %vm2245_vm2, %v2244_v51  ;;  %2023 = vmatprep.mubr.msk.f32.mxu1 %vm2245_vm2, %v2244_v51  ;;  %v2084_v26 = vpop.eup %2083  ;;  %v1090_v28 = vsel %vm408_vm3, %v2082_v23, 0.0 }
 0x468   :  { %2026 = vmatprep.subr.mxu0 %v2244_v51  ;;  %2031 = vmatprep.subr.mxu1 %v2244_v51  ;;  %v1096_v27 = vsel %vm408_vm3, %v2084_v26, 0.0 }
 0x469   :  { %2019 = vmatmul.mubr.msk.f32.vlgmr.msra.gmra.mxu0 %vm408_vm3, %v2082_v23  ;;  %2024 = vmatmul.mubr.msk.f32.vlgmr.msra.gmra.mxu1 %vm408_vm3, %v2078_v19 }
 0x46a   :  { %2027 = vmatpush3.msra.mxu0 %v1559_v21  ;;  %2032 = vmatpush3.msra.mxu1 %v1635_v25  ;;  %v1898_v21 = vld [vmem:[%s2606_s6] ss:$0 sm:$0xff] }
 0x46b   :  { %1094 = vadd.xlane.f32.xlu0 %v1093_v22  ;;  %1100 = vadd.xlane.f32.xlu1 %v1099_v24 }
 0x46c   :  { %2028 = vmatprep.mubr.msk.f32.mxu0 %vm2245_vm2, %v2244_v51  ;;  %2033 = vmatprep.mubr.msk.f32.mxu1 %vm2245_vm2, %v2244_v51 }
 0x46d   :  { %2029 = vmatmul.mubr.msk.f32.vlgmr.msra.gmra.mxu0 %vm408_vm3, %v2084_v26  ;;  %2034 = vmatmul.mubr.msk.f32.vlgmr.msra.gmra.mxu1 %vm408_vm3, %v2080_v20 }
 0x46e   :  { %2036 = vmatprep.subr.mxu0 %v1761_v36 }
 0x46f   :  { %1097 = vadd.xlane.f32.xlu0 %v1096_v27  ;;  %1091 = vadd.xlane.f32.xlu1 %v1090_v28 }
 0x470   :  { %2037 = vmatpush3.msra.mxu0 %v1761_v36 }
 0x471   :  { %2038 = vmatprep.subr.mxu0 %v1760_v37 }
 0x472   :  { %2039 = vmatpush3.msra.mxu0 %v1760_v37 }
 0x473   :  { %1079 = vadd.xlane.f32.xlu0 %v1078_v29  ;;  %2040 = vmatprep.subr.mxu0 %v1759_v41 }
 0x474   :  { %2041 = vmatpush3.msra.mxu0 %v1759_v41 }
 0x475   :  { %2042 = vmatprep.subr.mxu0 %v1758_v45 }
 0x476   :  { %2043 = vmatpush3.msra.mxu0 %v1758_v45 }
 0x4b7   :  { %v2580_v30 = vpop.f32.mrf.mxu0 }
 0x4b9   :  { %v2000_v31 = vpop.f32.mrf.mxu0 }
 0x4ea   :  { %v1083_v32 = vpop.xlane.xlu1 %1082 }
 0x4eb   :  { %2085 = vrcp.f32 %v1083_v32 }
 0x4ef   :  { %v1086_v33 = vpop.xlane.xlu0 %1085  ;;  %v1089_v34 = vpop.xlane.xlu1 %1088 }
 0x4f0   :  { %2087 = vrcp.f32 %v1086_v33 }
 0x4f4   :  { %v1095_v51 = vpop.xlane.xlu0 %1094  ;;  %v1101_v39 = vpop.xlane.xlu1 %1100 }
 0x4f5   :  { %2089 = vrcp.f32 %v1095_v51 }
 0x4f6   :  { %2091 = vrcp.f32 %v1089_v34 }
 0x4f8   :  { %v1098_v35 = vpop.xlane.xlu0 %1097  ;;  %v2086_v10 = vpop.eup %2085 }
 0x4f9   :  { %2093 = vrcp.f32 %v1098_v35  ;;  %v1092_v14 = vpop.xlane.xlu1 %1091 }
 0x4fa   :  { %2095 = vrcp.f32 %v1101_v39 }
 0x4fc   :  { %v1080_v61 = vpop.xlane.xlu0 %1079 }
 0x4fd   :  { %v2088_v42 = vpop.eup %2087  ;;  %2097 = vrcp.f32 %v1080_v61 }
 0x4fe   :  { %2099 = vrcp.f32 %v1092_v14 }
 0x502   :  { %v2090_v49 = vpop.eup %2089 }
 0x503   :  { %v2092_v53 = vpop.eup %2091 }
 0x506   :  { %v2094_v15 = vpop.eup %2093 }
 0x507   :  { %v2096_v59 = vpop.eup %2095 }
 0x50a   :  { %v2098_v63 = vpop.eup %2097 }
 0x50b   :  { %v1718_v2 = vmul.f32 %v2098_v63, %v2580_v30  ;;  %v2100_v4 = vpop.eup %2099 }
 0x520   :  { %v1250_v38 = vpop.f32.mrf.mxu1 }
 0x521   :  { %v1719_v40 = vmul.f32 %v2086_v10, %v1250_v38 }
 0x522   :  { %v2005_v9 = vpop.f32.mrf.mxu1 }
 0x523   :  { %1728 = vrot.lane.b32.xlu0 %v1719_v40, %s2233_s12 }
 0x524   :  { %v1326_v43 = vpop.f32.mrf.mxu0  ;;  %v1402_v44 = vpop.f32.mrf.mxu1 }
 0x525   :  { %v1720_v46 = vmul.f32 %v2088_v42, %v1326_v43  ;;  %v1721_v56 = vmul.f32 %v2092_v53, %v1402_v44 }
 0x526   :  { %v2010_v47 = vpop.f32.mrf.mxu0  ;;  %v2015_v48 = vpop.f32.mrf.mxu1 }
 0x527   :  { %1736 = vrot.lane.b32.xlu1 %v1720_v46, %s2248_s13 }
 0x529   :  { %v1478_v11 = vpop.f32.mrf.mxu0  ;;  %v1554_v13 = vpop.f32.mrf.mxu1 }
 0x52a   :  { %v1723_v16 = vmul.f32 %v2090_v49, %v1554_v13  ;;  %v1722_v8 = vmul.f32 %v2100_v4, %v1478_v11 }
 0x52b   :  { %v2020_v50 = vpop.f32.mrf.mxu0  ;;  %v2025_v52 = vpop.f32.mrf.mxu1 }
 0x52c   :  { %1730 = vrot.lane.b32.xlu1 %v1723_v16, %s2233_s12 }
 0x52d   :  { %v1630_v54 = vpop.f32.mrf.mxu0  ;;  %v1706_v55 = vpop.f32.mrf.mxu1 }
 0x52e   :  { %v1724_v57 = vmul.f32 %v2094_v15, %v1630_v54  ;;  %v1725_v60 = vmul.f32 %v2096_v59, %v1706_v55 }
 0x52f   :  { %v2030_v58 = vpop.f32.mrf.mxu0  ;;  %v2035_v12 = vpop.f32.mrf.mxu1 }
 0x530   :  { %1738 = vrot.lane.b32.xlu0 %v1724_v57, %s2248_s13  ;;  %1744 = vrot.lane.b32.xlu1 %v1721_v56, %s2249_s14 }
 0x534   :  { %1746 = vrot.lane.b32.xlu0 %v1725_v60, %s2249_s14 }
 0x595   :  { %v1729_v0 = vpop.permute.xlu0 %1728 }
 0x596   :  { %v1750_v3 = vsel %vm408_vm3, %v1718_v2, %v1729_v0 }
 0x599   :  { %v1737_v62 = vpop.permute.xlu1 %1736 }
 0x59a   :  { %v1753_v5 = vsel %vm1752_vm4, %v1750_v3, %v1737_v62 }
 0x59e   :  { %v1731_v1 = vpop.permute.xlu1 %1730 }
 0x59f   :  { %v1751_v18 = vsel %vm408_vm3, %v1722_v8, %v1731_v1 }
 0x5a2   :  { %v1739_v6 = vpop.permute.xlu0 %1738  ;;  %v1745_v7 = vpop.permute.xlu1 %1744 }
 0x5a3   :  { %v1756_v17 = vsel %vm1755_vm5, %v1753_v5, %v1745_v7  ;;  %v1754_v19 = vsel %vm1752_vm4, %v1751_v18, %v1739_v6 }
 0x5a4   :  { %2044 = vmatprep.mubr.msk.f32.mxu0 %vm104_vm0, %v1756_v17 }
 0x5a6   :  { %v1747_v20 = vpop.permute.xlu0 %1746 }
 0x5a7   :  { %v1757_v23 = vsel %vm1755_vm5, %v1754_v19, %v1747_v20 }
 0x5a8   :  { %2045 = vmatmul.mubr.msk.f32.vlgmr.msra.gmra.mxu0 %vm104_vm0, %v1757_v23 }
 0x668   :  { %v2046_v25 = vpop.f32.mrf.mxu0 }
 0x669   :  { %v1847_v22 = vadd.f32 %v2046_v25, %v1898_v21 }
 0x66a   :  { %v1841_v24 = vpop.f32.mrf.mxu0 }
 0x66b   :  { %1851 = vst.msk [vmem:[#allocation11 + $0x8] sm:$0xff] %vm104_vm0, %v1847_v22  ;;  %v1842_v26 = vadd.f32 %v1898_v21, %v1841_v24 }
 0x66d   :  { %1850 = vst.msk [vmem:[#allocation11] sm:$0xff] %vm104_vm0, %v1842_v26 }
 0x66e   :  { %2212 = shalt.err (!%p2209_p1)
}
 0x66f   :  { %1863 = dma.vmem_to_hbm [thread:$0]  %s1858_s17, 256, %s2607_s7, [#allocation4], %s2232_s11, %s2232_s11, %s2233_s12  }
 0x670   :  { %2227 = dma.done.wait [#allocation4], 256  }
 0x671   :  { %2228 = vsyncadd [#allocation4], 4294967040 }
 0x672   :  { %1867 = vsyncpa [#allocation3], 1 }
 0x673   :  { %1868 = vsyncpa [#allocation6], 1 }
 0x674   :  { %1869 = vsyncpa [#allocation9], 1 }
 0x675   :  { %1870 = vsyncpa [#allocation4], 1 }

</bundles_post_ra>
